<compile_context>
chip_gen: v5e
topology: v5e:2x2
jax: 0.10.0
libtpu: 0.0.40
codegen_flags: <defaults>
</compile_context>

<pallas_src>
import numpy as np
import jax
import jax.numpy as jnp
from jax.experimental import pallas as pl
from jax.experimental.pallas import tpu as pltpu


def _round_up(x, m):
    return ((x + m - 1) // m) * m


# ----------------------------------------------------------------------------
# Pallas featurizer.
#   grid = (B, n_neighbor_tiles); per step: one (Np,3)@(3,TJ) MXU pass for the
#   pairwise distances of this neighbor tile, then lane-dense (Np,TJ,F_pad)
#   VPU/EUP work accumulated into a f32 VMEM scratch; cast + write at last tile.
# ----------------------------------------------------------------------------
def make_featurizer_kernel(n_total, tile_j, r_cut, eta):
    def kernel(c_ref, cj_ref, mu_ref, out_ref, acc_ref):
        jt = pl.program_id(1)

        @pl.when(jt == 0)
        def _init():
            acc_ref[...] = jnp.zeros_like(acc_ref)

        c = c_ref[0]                                     # (Np, 3) f32 centers
        cj = cj_ref[0]                                   # (TJ, 3) f32 neighbors
        mu = mu_ref[...]                                 # (1, F_pad) f32

        # Pairwise squared distances for this neighbor tile via the MXU:
        #   d2[i, j] = |c_i|^2 + |c_j|^2 - 2 c_i . c_j
        csq = jnp.sum(c * c, axis=1, keepdims=True)      # (Np, 1)
        ones13 = jnp.ones((1, 3), jnp.float32)
        cjsq = jax.lax.dot_general(                      # (1, TJ)
            ones13, cj * cj, (((1,), (1,)), ((), ())),
            preferred_element_type=jnp.float32)
        cross = jax.lax.dot_general(                     # (Np, TJ)
            c, cj, (((1,), (1,)), ((), ())),
            preferred_element_type=jnp.float32)
        d2 = jnp.maximum(csq + cjsq - 2.0 * cross, 0.0)
        r = jnp.sqrt(d2)                                 # (Np, TJ)

        i_ids = jax.lax.broadcasted_iota(jnp.int32, (n_total, tile_j), 0)
        j_ids = (jax.lax.broadcasted_iota(jnp.int32, (n_total, tile_j), 1)
                 + jt * tile_j)
        fc = 0.5 * (jnp.cos(jnp.pi * jnp.minimum(r, r_cut) / r_cut) + 1.0)
        fc = jnp.where((i_ids == j_ids) | (r > r_cut), 0.0, fc)

        # Radial symmetry functions, reduced over this neighbor tile.
        g = jnp.exp(-eta * (r[:, :, None] - mu[None, :, :]) ** 2) * fc[:, :, None]
        acc_ref[...] += jnp.sum(g, axis=1)               # (Np, F_pad) f32

        @pl.when(jt == pl.num_programs(1) - 1)
        def _store():
            out_ref[0] = acc_ref[...].astype(out_ref.dtype)
    return kernel


def featurize_pallas(coords_packed, mu_padded, *, r_cut, eta, out_dtype,
                     tile_j=8):
    B, n_total, _ = coords_packed.shape
    f_pad = mu_padded.shape[-1]
    assert n_total % tile_j == 0
    return pl.pallas_call(
        make_featurizer_kernel(n_total, tile_j, float(r_cut), float(eta)),
        grid=(B, n_total // tile_j),
        in_specs=[
            pl.BlockSpec((1, n_total, 3), lambda b, jt: (b, 0, 0)),   # centers
            pl.BlockSpec((1, tile_j, 3), lambda b, jt: (b, jt, 0)),   # nbr tile
            pl.BlockSpec((1, f_pad), lambda b, jt: (0, 0)),           # RBF mus
        ],
        out_specs=pl.BlockSpec((1, n_total, f_pad), lambda b, jt: (b, 0, 0)),
        out_shape=jax.ShapeDtypeStruct((B, n_total, f_pad), out_dtype),
        scratch_shapes=[pltpu.VMEM((n_total, f_pad), jnp.float32)],
        compiler_params=pltpu.CompilerParams(
            dimension_semantics=("parallel", "arbitrary")),
    )(coords_packed, coords_packed, mu_padded)


# Pure-JAX reference featurizer (same math, used only by the reference model).
def featurize_reference(coords, n_rbf=32, r_cut=6.0, eta=4.0):
    B, N, _ = coords.shape
    diff = coords[:, :, None, :] - coords[:, None, :, :]        # [B, N, N, 3]
    d2 = jnp.sum(diff * diff, axis=-1)                          # [B, N, N]
    eye = jnp.eye(N, dtype=bool)[None]
    r = jnp.sqrt(jnp.where(eye, 1.0, d2))
    fc = 0.5 * (jnp.cos(jnp.pi * jnp.minimum(r, r_cut) / r_cut) + 1.0)
    fc = jnp.where(eye | (r > r_cut), 0.0, fc)
    mu = jnp.linspace(0.5, r_cut, n_rbf)
    g = jnp.exp(-eta * (r[..., None] - mu) ** 2) * fc[..., None]
    return jnp.sum(g, axis=2).astype(jnp.float32)               # [B, N, F]


# ----------------------------------------------------------------------------
# Fused per-species MLP + energy-reduction kernel.
#   grid = (batch_tiles, n_species); species is the reduction axis.
#   Hidden layers run as one lane-dense (rows, 128)@(128, 128) matmul chain;
#   padded rows are masked, reduced per batch element (sublane sum), and the
#   1-wide last layer is applied as a broadcast multiply + lane reduce.
# ----------------------------------------------------------------------------
def make_bpnn_mlp_kernel(num_hidden):
    def kernel(x_ref, mask_ref, *rest):
        out_ref = rest[-1]
        params = rest[:-1]   # [w0, b0, ..., w_last_row, b_last_eff]
        s = pl.program_id(1)

        @pl.when(s == 0)
        def _init():
            out_ref[...] = jnp.zeros_like(out_ref)

        xb = x_ref[...]                               # (Bt, Mn, F_pad)
        bt, mn, fp = xb.shape
        h = xb.reshape(bt * mn, fp)
        for i in range(num_hidden):
            w = params[2 * i][0]                      # (in_pad, H_pad)
            b = params[2 * i + 1][0]                  # (1, H_pad) f32
            h = jnp.dot(h.astype(w.dtype), w,
                        preferred_element_type=jnp.float32) + b
            h = jax.nn.silu(h)                        # activations stay f32

        w_last = params[-2][0]                        # (1, H_pad) compute dtype
        b_eff = params[-1][0]                         # (1, 1) f32 = n_s * b_last
        hp = h.shape[-1]
        # Round per-atom activations to compute dtype (matches per-layer
        # operand casting), mask padded rows, reduce atoms per batch element.
        h3 = h.astype(w_last.dtype).astype(jnp.float32).reshape(bt, mn, hp)
        m = mask_ref[...]                             # (1, Mn, 1) f32
        hb = jnp.sum(h3 * m, axis=1)                  # (Bt, H_pad) f32
        # Folded 1-wide last layer: broadcast multiply + lane reduce.
        e = jnp.sum(hb * w_last.astype(jnp.float32), axis=-1,
                    keepdims=True) + b_eff            # (Bt, 1)
        out_ref[0] += e
    return kernel


def bpnn_forward_pallas(atomic_numbers, coordinates, parameters, species_list,
                        num_layers, compute_dtype=jnp.float32,
                        n_rbf=32, r_cut=6.0, eta=4.0,
                        batch_tile=1, neighbor_tile=8):
    an = np.asarray(atomic_numbers)
    B = coordinates.shape[0]

    # Static per-species atom indices (skip species with no atoms).
    groups = []
    for z in species_list:
        idx = np.where(an == z)[0]
        if idx.size:
            groups.append((int(z), idx))
    if not groups:
        return jnp.zeros((B,), jnp.float32)

    S = len(groups)
    max_n = max(idx.size for _, idx in groups)
    max_n_pad = _round_up(max_n, max(8, neighbor_tile))
    n_total = S * max_n_pad

    F = n_rbf
    F_pad = _round_up(F, 128)

    # Species-contiguous padded atom layout; padding rows get far-away dummy
    # coordinates so they contribute fc = 0 to every real atom's features.
    gather_idx = np.zeros((n_total,), np.int32)
    valid = np.zeros((n_total,), np.float32)
    mask_np = np.zeros((S, max_n_pad, 1), np.float32)
    for s, (z, idx) in enumerate(groups):
        n_s = idx.size
        gather_idx[s * max_n_pad: s * max_n_pad + n_s] = idx
        valid[s * max_n_pad: s * max_n_pad + n_s] = 1.0
        mask_np[s, :n_s, 0] = 1.0

    coords = coordinates.astype(jnp.float32)
    coords_packed = jnp.take(coords, jnp.asarray(gather_idx), axis=1)
    valid_j = jnp.asarray(valid).reshape(1, n_total, 1)
    coords_packed = jnp.where(valid_j > 0, coords_packed, jnp.float32(1e4))

    # RBF centers padded with a huge value -> padded feature lanes are exactly 0.
    mu_np = np.full((1, F_pad), 1e6, np.float32)
    mu_np[0, :F] = np.linspace(0.5, r_cut, F, dtype=np.float32)
    mu = jnp.asarray(mu_np)

    x = featurize_pallas(coords_packed, mu, r_cut=r_cut, eta=eta,
                         out_dtype=compute_dtype, tile_j=neighbor_tile)

    # --- Stack per-species parameters, zero-padded to lane-dense shapes. -----
    z0 = groups[0][0]
    layer_dims = []
    for i in range(num_layers):
        w = parameters[f'atom_{z0}_weight_{i}']
        layer_dims.append((w.shape[1], w.shape[0]))   # (in_d, out_d)
    num_hidden = num_layers - 1

    BT = batch_tile
    assert B % BT == 0
    inputs = [x, jnp.asarray(mask_np)]
    in_specs = [
        pl.BlockSpec((BT, max_n_pad, F_pad), lambda bt, s: (bt, s, 0)),
        pl.BlockSpec((1, max_n_pad, 1), lambda bt, s: (s, 0, 0)),
    ]
    for i in range(num_hidden):
        in_d, out_d = layer_dims[i]
        in_pad, out_pad = _round_up(in_d, 128), _round_up(out_d, 128)
        w = jnp.stack([
            jnp.pad(jnp.transpose(parameters[f'atom_{z}_weight_{i}']),
                    ((0, in_pad - in_d), (0, out_pad - out_d)))
            for z, _ in groups], axis=0).astype(compute_dtype)
        b = jnp.stack([
            jnp.pad(parameters[f'atom_{z}_bias_{i}'].reshape(1, -1),
                    ((0, 0), (0, out_pad - out_d)))
            for z, _ in groups], axis=0).astype(jnp.float32)
        inputs += [w, b]
        in_specs += [
            pl.BlockSpec((1, in_pad, out_pad), lambda bt, s: (s, 0, 0)),
            pl.BlockSpec((1, 1, out_pad), lambda bt, s: (s, 0, 0)),
        ]

    # Final 1-wide layer folded after the per-batch atom reduction:
    #   sum_a (h_a . w_last + b_last) = (sum_a h_a) . w_last + n_s * b_last
    last_in, last_out = layer_dims[-1]
    assert last_out == 1
    last_in_pad = _round_up(last_in, 128)
    w_last = jnp.stack([
        jnp.pad(parameters[f'atom_{z}_weight_{num_layers - 1}'].reshape(1, -1),
                ((0, 0), (0, last_in_pad - last_in)))
        for z, _ in groups], axis=0).astype(compute_dtype)      # (S, 1, in_pad)
    b_eff = jnp.stack([
        (parameters[f'atom_{z}_bias_{num_layers - 1}'].reshape(1, 1)
         * jnp.float32(idx.size))
        for z, idx in groups], axis=0).astype(jnp.float32)       # (S, 1, 1)
    inputs += [w_last, b_eff]
    in_specs += [
        pl.BlockSpec((1, 1, last_in_pad), lambda bt, s: (s, 0, 0)),
        pl.BlockSpec((1, 1, 1), lambda bt, s: (s, 0, 0)),
    ]

    n_bt = B // BT
    out = pl.pallas_call(
        make_bpnn_mlp_kernel(num_hidden),
        grid=(n_bt, S),
        in_specs=in_specs,
        out_specs=pl.BlockSpec((1, BT, 1), lambda bt, s: (bt, 0, 0)),
        out_shape=jax.ShapeDtypeStruct((n_bt, BT, 1), jnp.float32),
        compiler_params=pltpu.CompilerParams(
            dimension_semantics=("parallel", "arbitrary")),   # species = reduce
    )(*inputs)
    return out.reshape(B)


# ----------------------------------------------------------------------------
# Pure-JAX reference (mirrors the PyTorch module semantics).
# ----------------------------------------------------------------------------
def bpnn_forward_reference(atomic_numbers, coordinates, parameters,
                           species_list, num_layers,
                           compute_dtype=jnp.float32,
                           n_rbf=32, r_cut=6.0, eta=4.0):
    x = featurize_reference(coordinates, n_rbf=n_rbf, r_cut=r_cut, eta=eta)
    B, N = coordinates.shape[0], coordinates.shape[1]
    energies = jnp.zeros((B, N), jnp.float32)
    an = np.asarray(atomic_numbers)
    for z in species_list:
        idx = np.where(an == z)[0]
        if idx.size == 0:
            continue
        atoms = x[:, idx]
        for i in range(num_layers):
            w = parameters[f'atom_{z}_weight_{i}']
            b = parameters[f'atom_{z}_bias_{i}']
            atoms = jnp.dot(atoms.astype(compute_dtype),
                            jnp.transpose(w).astype(compute_dtype),
                            preferred_element_type=jnp.float32) + b
            if i < num_layers - 1:
                atoms = jax.nn.silu(atoms)
        energies = energies.at[:, idx].set(atoms[..., 0])
    return energies.sum(axis=-1)


def init_parameters(key, species_list, num_layers, feat_dim, hidden_dim):
    params = {}
    for z in species_list:
        dims = [feat_dim] + [hidden_dim] * (num_layers - 1) + [1]
        for i in range(num_layers):
            in_d, out_d = dims[i], dims[i + 1]
            key, k1, k2 = jax.random.split(key, 3)
            params[f'atom_{z}_weight_{i}'] = (
                jax.random.normal(k1, (out_d, in_d), jnp.float32)
                / jnp.sqrt(jnp.float32(in_d)))
            params[f'atom_{z}_bias_{i}'] = (
                jax.random.normal(k2, (out_d,), jnp.float32) * 0.01)
    return params


if __name__ == "__main__":
    B, N_ATOMS, FEAT, HIDDEN, NUM_LAYERS = 2, 8, 32, 32, 3
    species_list = [1, 6, 8]
    atomic_numbers = np.array([1, 1, 8, 1, 1, 8, 6, 6], dtype=np.int32)

    key = jax.random.PRNGKey(0)
    key, kc, kp = jax.random.split(key, 3)
    coordinates = jax.random.normal(kc, (B, N_ATOMS, 3), jnp.float32) * 2.0
    parameters = init_parameters(kp, species_list, NUM_LAYERS, FEAT, HIDDEN)

    # f32 path: tight check against the pure-JAX reference.
    e_pallas = jax.block_until_ready(bpnn_forward_pallas(
        atomic_numbers, coordinates, parameters, species_list, NUM_LAYERS,
        compute_dtype=jnp.float32, n_rbf=FEAT))
    e_ref = jax.block_until_ready(bpnn_forward_reference(
        atomic_numbers, coordinates, parameters, species_list, NUM_LAYERS,
        compute_dtype=jnp.float32, n_rbf=FEAT))
    assert e_pallas.shape == (B,)
    np.testing.assert_allclose(np.asarray(e_pallas), np.asarray(e_ref),
                               rtol=5e-3, atol=5e-3)

    # bf16 matmul path (f32 accumulation) against a matching bf16 reference.
    e_pallas_bf16 = jax.block_until_ready(bpnn_forward_pallas(
        atomic_numbers, coordinates, parameters, species_list, NUM_LAYERS,
        compute_dtype=jnp.bfloat16, n_rbf=FEAT))
    e_ref_bf16 = jax.block_until_ready(bpnn_forward_reference(
        atomic_numbers, coordinates, parameters, species_list, NUM_LAYERS,
        compute_dtype=jnp.bfloat16, n_rbf=FEAT))
    np.testing.assert_allclose(np.asarray(e_pallas_bf16),
                               np.asarray(e_ref_bf16),
                               rtol=2e-2, atol=2e-2)

    print("KERNEL_OK")
</pallas_src>

<mosaic_0001>
module attributes {stable_mosaic.version = 11 : i64} {
  func.func @kernel(%arg0: i32, %arg1: i32, %arg2: memref<1x24x3xf32, #tpu.memory_space<vmem>>, %arg3: memref<1x8x3xf32, #tpu.memory_space<vmem>>, %arg4: memref<1x128xf32, #tpu.memory_space<vmem>>, %arg5: memref<1x24x128xf32, #tpu.memory_space<vmem>>, %arg6: memref<24x128xf32, #tpu.memory_space<vmem>>) attributes {dimension_semantics = [#tpu.dimension_semantics<parallel>, #tpu.dimension_semantics<arbitrary>], iteration_bounds = array<i64: 2, 3>, scalar_prefetch = 0 : i64, scratch_operands = 1 : i64, tpu.core_type = #tpu.core_type<tc>, window_params = [{transform_indices = @transform_0, window_bounds = array<i64: 1, 24, 3>}, {transform_indices = @transform_1, window_bounds = array<i64: 1, 8, 3>}, {pipeline_mode = #tpu.pipeline_mode<synchronous>, transform_indices = @transform_2, window_bounds = array<i64: 1, 128>}, {transform_indices = @transform_3, window_bounds = array<i64: 1, 24, 128>}]} {
    %c0_i32 = arith.constant 0 : i32
    %0 = arith.cmpi eq, %arg1, %c0_i32 : i32
    %1 = arith.extui %0 : i1 to i32
    %c0_i32_0 = arith.constant 0 : i32
    %2 = arith.cmpi ne, %1, %c0_i32_0 : i32
    scf.if %2 {
      %cst_27 = arith.constant 0.000000e+00 : f32
      %65 = vector.broadcast %cst_27 : f32 to vector<24x128xf32>
      %c0_28 = arith.constant 0 : index
      %c0_29 = arith.constant 0 : index
      %66 = vector.load %arg6[%c0_28, %c0_29] : memref<24x128xf32, #tpu.memory_space<vmem>>, vector<24x128xf32>
      tpu.vector_store %arg6[%c0_28, %c0_29], %65 {strides = array<i32>} : memref<24x128xf32, #tpu.memory_space<vmem>>, vector<24x128xf32>,
    } else {
    }
    %c0 = arith.constant 0 : index
    %c0_1 = arith.constant 0 : index
    %c0_2 = arith.constant 0 : index
    %3 = vector.load %arg2[%c0, %c0_1, %c0_2] : memref<1x24x3xf32, #tpu.memory_space<vmem>>, vector<1x24x3xf32>
    %4 = vector.shape_cast %3 : vector<1x24x3xf32> to vector<24x3xf32>
    %c0_3 = arith.constant 0 : index
    %c0_4 = arith.constant 0 : index
    %c0_5 = arith.constant 0 : index
    %5 = vector.load %arg3[%c0_3, %c0_4, %c0_5] : memref<1x8x3xf32, #tpu.memory_space<vmem>>, vector<1x8x3xf32>
    %6 = vector.shape_cast %5 : vector<1x8x3xf32> to vector<8x3xf32>
    %c0_6 = arith.constant 0 : index
    %c0_7 = arith.constant 0 : index
    %7 = vector.load %arg4[%c0_6, %c0_7] : memref<1x128xf32, #tpu.memory_space<vmem>>, vector<1x128xf32>
    %8 = arith.mulf %4, %4 : vector<24x3xf32>
    %cst = arith.constant dense<0.000000e+00> : vector<24xf32>
    %9 = vector.multi_reduction <add>, %8, %cst [1] : vector<24x3xf32> to vector<24xf32>
    %10 = vector.shape_cast %9 : vector<24xf32> to vector<24x1xf32>
    %cst_8 = arith.constant 1.000000e+00 : f32
    %11 = vector.broadcast %cst_8 : f32 to vector<1x3xf32>
    %12 = arith.mulf %6, %6 : vector<8x3xf32>
    %cst_9 = arith.constant dense<0.000000e+00> : vector<1x8xf32>
    %13 = tpu.matmul %11, %12, %cst_9 {dimension_numbers = #tpu.dot_dimension_numbers<[1], [1], [0], [0], [0, 0, 1, 0], [], []>} : vector<1x3xf32>, vector<8x3xf32>, vector<1x8xf32> -> vector<1x8xf32>
    %cst_10 = arith.constant dense<0.000000e+00> : vector<24x8xf32>
    %14 = tpu.matmul %4, %6, %cst_10 {dimension_numbers = #tpu.dot_dimension_numbers<[1], [1], [0], [0], [0, 0, 1, 0], [], []>} : vector<24x3xf32>, vector<8x3xf32>, vector<24x8xf32> -> vector<24x8xf32>
    %15 = vector.broadcast %10 : vector<24x1xf32> to vector<24x8xf32>
    %16 = vector.broadcast %13 : vector<1x8xf32> to vector<24x8xf32>
    %17 = arith.addf %15, %16 : vector<24x8xf32>
    %cst_11 = arith.constant 2.000000e+00 : f32
    %18 = vector.broadcast %cst_11 : f32 to vector<24x8xf32>
    %19 = arith.mulf %18, %14 : vector<24x8xf32>
    %20 = arith.subf %17, %19 : vector<24x8xf32>
    %cst_12 = arith.constant 0.000000e+00 : f32
    %21 = vector.broadcast %cst_12 : f32 to vector<24x8xf32>
    %22 = arith.maximumf %20, %21 : vector<24x8xf32>
    %23 = math.sqrt %22 : vector<24x8xf32>
    %24 = tpu.iota {dimensions = array<i32: 0>} : vector<24x8xi32>
    %25 = tpu.iota {dimensions = array<i32: 1>} : vector<24x8xi32>
    %c8_i32 = arith.constant 8 : i32
    %26 = arith.muli %arg1, %c8_i32 : i32
    %27 = vector.broadcast %26 : i32 to vector<24x8xi32>
    %28 = arith.addi %25, %27 : vector<24x8xi32>
    %cst_13 = arith.constant 6.000000e+00 : f32
    %29 = vector.broadcast %cst_13 : f32 to vector<24x8xf32>
    %30 = arith.minimumf %23, %29 : vector<24x8xf32>
    %cst_14 = arith.constant 3.14159274 : f32
    %31 = vector.broadcast %cst_14 : f32 to vector<24x8xf32>
    %32 = arith.mulf %31, %30 : vector<24x8xf32>
    %cst_15 = arith.constant 6.000000e+00 : f32
    %33 = vector.broadcast %cst_15 : f32 to vector<24x8xf32>
    %34 = arith.divf %32, %33 : vector<24x8xf32>
    %35 = math.cos %34 : vector<24x8xf32>
    %cst_16 = arith.constant 1.000000e+00 : f32
    %36 = vector.broadcast %cst_16 : f32 to vector<24x8xf32>
    %37 = arith.addf %35, %36 : vector<24x8xf32>
    %cst_17 = arith.constant 5.000000e-01 : f32
    %38 = vector.broadcast %cst_17 : f32 to vector<24x8xf32>
    %39 = arith.mulf %38, %37 : vector<24x8xf32>
    %40 = arith.cmpi eq, %24, %28 : vector<24x8xi32>
    %cst_18 = arith.constant 6.000000e+00 : f32
    %41 = vector.broadcast %cst_18 : f32 to vector<24x8xf32>
    %42 = arith.cmpf ogt, %23, %41 : vector<24x8xf32>
    %43 = arith.ori %40, %42 : vector<24x8xi1>
    %cst_19 = arith.constant 0.000000e+00 : f32
    %44 = vector.broadcast %cst_19 : f32 to vector<24x8xf32>
    %45 = arith.select %43, %44, %39 : vector<24x8xi1>, vector<24x8xf32>
    %46 = vector.shape_cast %23 : vector<24x8xf32> to vector<24x8x1xf32>
    %47 = vector.shape_cast %7 : vector<1x128xf32> to vector<1x1x128xf32>
    %48 = vector.broadcast %46 : vector<24x8x1xf32> to vector<24x8x128xf32>
    %49 = vector.broadcast %47 : vector<1x1x128xf32> to vector<24x8x128xf32>
    %50 = arith.subf %48, %49 : vector<24x8x128xf32>
    %51 = arith.mulf %50, %50 : vector<24x8x128xf32>
    %cst_20 = arith.constant -4.000000e+00 : f32
    %52 = vector.broadcast %cst_20 : f32 to vector<24x8x128xf32>
    %53 = arith.mulf %52, %51 : vector<24x8x128xf32>
    %54 = math.exp %53 : vector<24x8x128xf32>
    %55 = vector.shape_cast %45 : vector<24x8xf32> to vector<24x8x1xf32>
    %56 = vector.broadcast %55 : vector<24x8x1xf32> to vector<24x8x128xf32>
    %57 = arith.mulf %54, %56 : vector<24x8x128xf32>
    %c0_21 = arith.constant 0 : index
    %c0_22 = arith.constant 0 : index
    %58 = vector.load %arg6[%c0_21, %c0_22] : memref<24x128xf32, #tpu.memory_space<vmem>>, vector<24x128xf32>
    %cst_23 = arith.constant dense<0.000000e+00> : vector<24x128xf32>
    %59 = vector.multi_reduction <add>, %57, %cst_23 [1] : vector<24x8x128xf32> to vector<24x128xf32>
    %60 = arith.addf %58, %59 : vector<24x128xf32>
    %c0_24 = arith.constant 0 : index
    %c0_25 = arith.constant 0 : index
    %61 = vector.load %arg6[%c0_24, %c0_25] : memref<24x128xf32, #tpu.memory_space<vmem>>, vector<24x128xf32>
    tpu.vector_store %arg6[%c0_24, %c0_25], %60 {strides = array<i32>} : memref<24x128xf32, #tpu.memory_space<vmem>>, vector<24x128xf32>,
    %c2_i32 = arith.constant 2 : i32
    %62 = arith.cmpi eq, %arg1, %c2_i32 : i32
    %63 = arith.extui %62 : i1 to i32
    %c0_i32_26 = arith.constant 0 : i32
    %64 = arith.cmpi ne, %63, %c0_i32_26 : i32
    scf.if %64 {
      %c0_27 = arith.constant 0 : index
      %c0_28 = arith.constant 0 : index
      %65 = vector.load %arg6[%c0_27, %c0_28] : memref<24x128xf32, #tpu.memory_space<vmem>>, vector<24x128xf32>
      %c0_29 = arith.constant 0 : index
      %c0_30 = arith.constant 0 : index
      %c0_31 = arith.constant 0 : index
      %66 = vector.load %arg5[%c0_29, %c0_30, %c0_31] : memref<1x24x128xf32, #tpu.memory_space<vmem>>, vector<1x24x128xf32>
      %67 = vector.shape_cast %66 : vector<1x24x128xf32> to vector<24x128xf32>
      %68 = vector.shape_cast %65 : vector<24x128xf32> to vector<1x24x128xf32>
      tpu.vector_store %arg5[%c0_29, %c0_30, %c0_31], %68 {strides = array<i32>} : memref<1x24x128xf32, #tpu.memory_space<vmem>>, vector<1x24x128xf32>,
    } else {
    }
    return
  }
  func.func @transform_0(%arg0: i32, %arg1: i32) -> (i32, i32, i32) {
    %c0_i32 = arith.constant 0 : i32
    %c0_i32_0 = arith.constant 0 : i32
    %c0_i32_1 = arith.constant 0 : i32
    return %arg0, %c0_i32, %c0_i32_0 : i32, i32, i32
  }
  func.func @transform_1(%arg0: i32, %arg1: i32) -> (i32, i32, i32) {
    %c0_i32 = arith.constant 0 : i32
    %c0_i32_0 = arith.constant 0 : i32
    return %arg0, %arg1, %c0_i32 : i32, i32, i32
  }
  func.func @transform_2(%arg0: i32, %arg1: i32) -> (i32, i32) {
    %c0_i32 = arith.constant 0 : i32
    %c0_i32_0 = arith.constant 0 : i32
    %c0_i32_1 = arith.constant 0 : i32
    return %c0_i32, %c0_i32_0 : i32, i32
  }
  func.func @transform_3(%arg0: i32, %arg1: i32) -> (i32, i32, i32) {
    %c0_i32 = arith.constant 0 : i32
    %c0_i32_0 = arith.constant 0 : i32
    %c0_i32_1 = arith.constant 0 : i32
    return %arg0, %c0_i32, %c0_i32_0 : i32, i32, i32
  }
}

</mosaic_0001>

<bundles_post_ra>
// kernel: tpu_custom_call.1
= control target key start
LH: loop header
LB: loop body
LE: loop exit
PB: predicated region body
PF: predicated region fallthrough
CT: control target
= control target key end

     0   :  { %8 = vsyncpa [#allocation4], 0  ;;  %s2626_s0 = inlined_call_operand.vmem [shape: f32[2,24,3], index: 0, kind: input, shape index: {}]   ;;  %s2627_s1 = inlined_call_operand.vmem [shape: f32[2,24,3], index: 1, kind: input, shape index: {}]   ;;  %s2628_s2 = inlined_call_operand.vmem [shape: f32[1,128], index: 2, kind: input, shape index: {}]   ;;  %s2629_s3 = inlined_call_operand.hbm [shape: f32[2,24,128], index: 3, kind: output, shape index: {}]  }
   0x1   :  { %10 = vsyncpa [#allocation4 + $0x1], 0  ;;  %s1969_s12 = smov 0   ;;  %s1971_s13 = smov 0  }
   0x2   :  { %s1973_s14 = smov 0   ;;  %s1975_s15 = smov 0  }
   0x3   :  { %s1977_s16 = smov 0   ;;  %s1979_s17 = smov 0  }
   0x4   :  { %s1981_s18 = smov 0   ;;  %s1983_s19 = smov 0  }
   0x5 LB: > { %s1664_s20 = sadd.s32 4294967295, %s1935_s19   ;;  %s1665_s21 = sadd.s32 4294967294, %s1935_s19   ;;  %s1935_s19 = sphi %s1983_s19, %s16_s19   ;;  %s1931_s18 = sphi %s1981_s18, %s2651_s18   ;;  %s1927_s17 = sphi %s1979_s17, %s2650_s17   ;;  %s1923_s16 = sphi %s1977_s16, %s2649_s16   ;;  %s1919_s15 = sphi %s1975_s15, %s2648_s15   ;;  %s1915_s14 = sphi %s1973_s14, %s2647_s14   ;;  %s1911_s13 = sphi %s1971_s13, %s2646_s13   ;;  %s1907_s12 = sphi %s1969_s12, %s2645_s12  }
   0x6   : > { %s25_s22 = sadd.s32 1, %s1927_s17  ;;  %s28_s23 = sadd.s32 1, %s1931_s18 }
   0x7   : > { %p26_p0 = scmp.ge.s32.totalorder %s25_s22, 3  ;;  %p120_p1 = scmp.ne.s32.totalorder %s1915_s14, %s1911_s13 }
   0x8   : > { %p121_p2 = scmp.eq.s32.totalorder %s1664_s20, 5  ;;  %p126_p4 = scmp.ne.s32.totalorder %s1911_s13, %s1907_s12 }
   0x9   : > { %s2653_s22 = smov (%p26_p0, %s25_s22), 0  ;;  %s2655_s23 = smov (!%p26_p0, %s28_s23), %s1931_s18 }
   0xa   : > { %p2018_p3 = por %p121_p2, %p120_p1  ;;  %p30_p5 = scmp.ge.s32.totalorder %s2655_s23, 2 }
   0xb   : > { %p127_p6 = scmp.eq.s32.totalorder %s1665_s21, 5  ;;  %p1668_p7 = scmp.ge.s32.totalorder %s1935_s19, 1 }
   0xc   : > { %p167_p8 = scmp.lt.s32.totalorder %s1935_s19, 7  ;;  %s2657_s23 = smov (%p30_p5, %s2655_s23), 0 }
   0xd   : > { %2632 = sst [smem:[#allocation6_spill]] %s2657_s23  ;;  %p2028_p9 = por %p127_p6, %p126_p4 }
   0xe   : > { %p168_p10 = pnand %p1668_p7, %p167_p8  ;;  %s107_s26 = ssub.s32 %s1931_s18, %s2657_s23 }
   0xf   : > { %s110_s27 = sadd.s32 1, %s1915_s14  ;;  %p108_p11 = scmp.eq.s32.totalorder %s107_s26, 0 }
  0x10   : > { %171 = sbr.rel (%p168_p10) target bundleno = 549 (0x225), region = 32  ;;  %s196_s29 = sand.u32 (!%p168_p10), 1, %s1911_s13  }
  0x11   : > { %s2036_s28 = scalar_select %p108_p11, %s1915_s14, %s110_s27  }
  0x12   : > { %p199_p12 = scmp.lt.s32.totalorder (!%p168_p10), %s1923_s16, 1  ;;  %s1694_s30 = smul.u32 (!%p168_p10), 24, %s196_s29 }
  0x13   : > { %p206_p13 = scmp.lt.s32.totalorder (!%p168_p10), %s1919_s15, 2  ;;  %p1671_p0 = scmp.ne.s32.totalorder (!%p168_p10), %s1919_s15, 0 }
  0x14   : > { %s2051_s23 = scalar_lea.vmem (!%p168_p10), [#allocation3], %s1694_s30 }
  0x15   : > { %s200_s4 = scalar_select %p199_p12, %s1923_s16, 1 }
  0x16   : > { %s207_s6 = scalar_select %p206_p13, %s1919_s15, 2 }
  0x17   : > { %s1695_s5 = smul.u32 24, %s200_s4 }
  0x18   : > { %s1696_s10 = smul.u32 3, %s200_s4 }
  0x19   : > { %s203_s9 = scalar_lea.vmem %s2626_s0, %s1695_s5  ;;  %215 = sbr.rel (%p1671_p0) target bundleno = 34 (0x22), region = 36 }
  0x1a   : > { %s209_s11 = sadd.s32 %s1696_s10, %s207_s6 }
  0x1b   : > { %s1670_s20 = sshll.u32 %s209_s11, 3 }
  0x1c   : > { %s211_s27 = scalar_lea.vmem %s2627_s1, %s1670_s20 }
  0x1e   : > { %v1937_v0 = vmov 0.0  }
  0x1f   : > { %216 = vst [vmem:[#allocation2 + $0x10] sm:$0xff] %v1937_v0 }
  0x20   : > { %217 = vst [vmem:[#allocation2] sm:$0xff] %v1937_v0 }
  0x21   : > { %218 = vst [vmem:[#allocation2 + $0x8] sm:$0xff] %v1937_v0 }
  0x22 PF: > { %v222_v1 = vld [vmem:[%s211_s27] sm:$0xff]  ;;  %vm227_vm0 = vcmask 23552   ;;  %v221_v2 = vld [vmem:[%s203_s9 + $0x10] sm:$0xff]  ;;  %v220_v4 = vld [vmem:[%s203_s9 + $0x8] sm:$0xff]  ;;  %v1938_v10 = vmov 1.0   ;;  %v351_v13 = vlaneseq  ;;  %v1939_v35 = vmov 6.0  }
  0x23   : > { %1692 = vmatpush.xpose.msk.msra.mxu2 %vm227_vm0, %v222_v1  ;;  %1693 = vmatpush.xpose.msk.msra.mxu3 %vm227_vm0, %v222_v1  ;;  %v237_v3 = vmul.f32 %v222_v1, %v222_v1  ;;  %v219_v5 = vld [vmem:[%s203_s9] sm:$0xff]  ;;  %v226_v6 = vmul.f32 %v221_v2, %v221_v2  ;;  %v225_v11 = vmul.f32 %v220_v4, %v220_v4  ;;  %s1678_s30 = sshll.u32 %s1919_s15, 3  ;;  %p1688_p1 = scmp.ne.s32.totalorder %s1919_s15, 2 }
  0x24   : > { %1674 = vmatpush.xpose.msk.msra.mxu1 %vm227_vm0, %v222_v1  ;;  %v224_v7 = vmul.f32 %v219_v5, %v219_v5  ;;  %v2065_v15 = vshrl.u32 %v351_v13, 7  ;;  %v356_v58 = vand.u32 127, %v351_v13  ;;  %v358_v61 = vstv %s1678_s30 }
  0x25   : > { %1672 = vmatpush.xpose.msk.msra.mxu0 %vm227_vm0, %v237_v3  ;;  %v234_v8 = vsel %vm227_vm0, %v226_v6, 0.0  ;;  %v231_v12 = vsel %vm227_vm0, %v225_v11, 0.0 }
  0x26   : > { %1676 = vmatmul.msk.f32.vlgmr.msra.gmra.mxu2 %vm227_vm0, %v220_v4  ;;  %1677 = vmatmul.msk.f32.vlgmr.msra.gmra.mxu3 %vm227_vm0, %v221_v2  ;;  %v228_v9 = vsel %vm227_vm0, %v224_v7, 0.0  ;;  %v2076_v6 = vadd.s32 %v358_v61, %v356_v58 }
  0x27   : > { %1675 = vmatmul.msk.f32.vlgmr.msra.gmra.mxu1 %vm227_vm0, %v219_v5  ;;  %229 = vadd.xlane.f32.xlu0 %v228_v9  ;;  %v353_v9 = vadd.s32 8, %v2065_v15 }
  0x28   : > { %1673 = vmatmul.msk.f32.vlgmr.msra.gmra.mxu0 %vm227_vm0, %v1938_v10  ;;  %235 = vadd.xlane.f32.xlu1 %v234_v8  ;;  %vm844_vm8 = vcmp.eq.s32.totalorder %v2065_v15, %v2076_v6 }
  0x29   : > { %1783 = vset.pattern.permute.xlu0 %v2065_v15  ;;  %1782 = vset.pattern.permute.xlu2 %v2065_v15  ;;  %vm845_vm9 = vcmp.eq.s32.totalorder %v353_v9, %v2076_v6 }
  0x2a   : > { %1781 = vset.pattern.permute.xlu1 %v2065_v15 }
  0x2f   : > { %232 = vadd.xlane.f32.xlu0 %v231_v12 }
  0x9a   : > { %v230_v14 = vpop.xlane.xlu0 %229 }
  0x9b   : > { %v236_v19 = vpop.xlane.xlu1 %235 }
  0xa2   : > { %v233_v21 = vpop.xlane.xlu0 %232 }
  0xa4   : > { %v293_v16 = vpop.f32.mrf.mxu1 }
  0xa5   : > { %v261_v17 = vpop.f32.mrf.mxu0  ;;  %v306_v20 = vmul.f32 2.0, %v293_v16 }
  0xa6   : > { %v302_v18 = vperm.slane %v261_v17, 0 }
  0xa8   : > { %v303_v22 = vadd.f32 %v302_v18, %v230_v14  ;;  %v305_v23 = vadd.f32 %v302_v18, %v236_v19  ;;  %v304_v27 = vadd.f32 %v302_v18, %v233_v21 }
  0xa9   : > { %v296_v24 = vpop.f32.mrf.mxu2  ;;  %v299_v25 = vpop.f32.mrf.mxu3 }
  0xaa   : > { %v309_v26 = vsub.f32 %v303_v22, %v306_v20  ;;  %v307_v28 = vmul.f32 2.0, %v296_v24  ;;  %v308_v29 = vmul.f32 2.0, %v299_v25 }
  0xac   : > { %v312_v30 = vmax.f32 %v309_v26, 0.0  ;;  %v310_v31 = vsub.f32 %v304_v27, %v307_v28  ;;  %v311_v32 = vsub.f32 %v305_v23, %v308_v29 }
  0xae   : > { %1785 = vrsqrt.f32 %v312_v30  ;;  %v313_v33 = vmax.f32 %v310_v31, 0.0  ;;  %v314_v34 = vmax.f32 %v311_v32, 0.0  ;;  %vm322_vm1 = vcmp.eq.f32.partialorder %v312_v30, inf }
  0xaf   : > { %1787 = vrcp.f32 %v1939_v35  ;;  %v325_v56 = vand.u32 2147483648, %v312_v30  ;;  %vm324_vm2 = vcmp.eq.f32.partialorder %v312_v30, 0.0 }
  0xb0   : > { %1789 = vrsqrt.f32 %v313_v33  ;;  %vm334_vm3 = vcmp.eq.f32.partialorder %v313_v33, inf  ;;  %vm346_vm4 = vcmp.eq.f32.partialorder %v314_v34, inf  ;;  %v337_v7 = vand.u32 2147483648, %v313_v33 }
  0xb1   : > { %1791 = vrsqrt.f32 %v314_v34  ;;  %vm336_vm5 = vcmp.eq.f32.partialorder %v313_v33, 0.0  ;;  %v349_v10 = vand.u32 2147483648, %v314_v34  ;;  %vm348_vm6 = vcmp.eq.f32.partialorder %v314_v34, 0.0 }
  0xb4   : > { %v1786_v36 = vpop.eup %1785 }
  0xb5   : > { %v316_v37 = vmul.f32 %v1786_v36, %v312_v30  ;;  %v1788_v38 = vpop.eup %1787 }
  0xb6   : > { %v1790_v39 = vpop.eup %1789  ;;  %v367_v46 = vmul.f32 6.0, %v1788_v38  ;;  %vm371_vm7 = vweird.f32 %v1788_v38 }
  0xb7   : > { %v317_v40 = vmul.f32 %v1786_v36, %v316_v37  ;;  %v1792_v41 = vpop.eup %1791  ;;  %v328_v42 = vmul.f32 %v1790_v39, %v313_v33 }
  0xb8   : > { %v340_v44 = vmul.f32 %v1792_v41, %v314_v34  ;;  %v368_v53 = vsub.f32 1.0, %v367_v46 }
  0xb9   : > { %v318_v43 = vmul.f32 0.5, %v317_v40  ;;  %v329_v45 = vmul.f32 %v1790_v39, %v328_v42 }
  0xba   : > { %v341_v48 = vmul.f32 %v1792_v41, %v340_v44  ;;  %v369_v0 = vmul.f32 %v1788_v38, %v368_v53 }
  0xbb   : > { %v319_v47 = vsub.f32 1.5, %v318_v43  ;;  %v330_v49 = vmul.f32 0.5, %v329_v45 }
  0xbc   : > { %v342_v51 = vmul.f32 0.5, %v341_v48  ;;  %v370_v11 = vadd.f32 %v1788_v38, %v369_v0 }
  0xbd   : > { %v320_v50 = vmul.f32 %v1786_v36, %v319_v47  ;;  %v331_v52 = vsub.f32 1.5, %v330_v49 }
  0xbe   : > { %v343_v55 = vsub.f32 1.5, %v342_v51  ;;  %v372_v16 = vsel %vm371_vm7, %v1788_v38, %v370_v11 }
  0xbf   : > { %v321_v54 = vmul.f32 %v320_v50, %v312_v30  ;;  %v332_v57 = vmul.f32 %v1790_v39, %v331_v52 }
  0xc0   : > { %v344_v60 = vmul.f32 %v1792_v41, %v343_v55 }
  0xc1   : > { %v323_v59 = vsel %vm322_vm1, %v312_v30, %v321_v54  ;;  %v333_v62 = vmul.f32 %v332_v57, %v313_v33 }
  0xc2   : > { %v2071_v63 = vsel %vm324_vm2, %v325_v56, %v323_v59  ;;  %v345_v1 = vmul.f32 %v344_v60, %v314_v34 }
  0xc3   : > { %v877_v2 = vperm.slane %v2071_v63, 3  ;;  %v863_v3 = vperm.slane %v2071_v63, 1  ;;  %v856_v4 = vperm.slane %v2071_v63, 0  ;;  %v335_v5 = vsel %vm334_vm3, %v313_v33, %v333_v62 }
  0xc4   : > { %v347_v8 = vsel %vm346_vm4, %v314_v34, %v345_v1  ;;  %v2079_v12 = vsel %vm336_vm5, %v337_v7, %v335_v5  ;;  %v360_v14 = vmin.f32 %v2071_v63, 6.0  ;;  %vm847_vm10 = vcmp.gt.f32.partialorder %v2071_v63, 6.0 }
  0xc5   : > { %882 = vperm.xlu0 %1783, %v877_v2   ;;  %868 = vperm.xlu2 %1782, %v863_v3   ;;  %v2081_v13 = vsel %vm348_vm6, %v349_v10, %v347_v8  ;;  %v361_v17 = vmin.f32 %v2079_v12, 6.0  ;;  %v870_v18 = vperm.slane %v2071_v63, 2  ;;  %v940_v19 = vperm.slane %v2079_v12, 4  ;;  %vm2091_vm11 = vmor %vm844_vm8, %vm847_vm10 }
  0xc6   : > { %861 = vperm.xlu1 %1781, %v856_v4   ;;  %vm848_vm12 = vcmp.gt.f32.partialorder %v2079_v12, 6.0  ;;  %v362_v21 = vmin.f32 %v2081_v13, 6.0  ;;  %v905_v22 = vperm.slane %v2071_v63, 7  ;;  %v363_v23 = vmul.f32 3.1415927, %v360_v14 }
  0xc7   : > { %v364_v24 = vmul.f32 3.1415927, %v361_v17  ;;  %vm2098_vm13 = vmor %vm845_vm9, %vm848_vm12  ;;  %v884_v34 = vperm.slane %v2071_v63, 4  ;;  %v961_v37 = vperm.slane %v2079_v12, 7  ;;  %v919_v41 = vperm.slane %v2079_v12, 1 }
  0xc8   : > { %v365_v26 = vmul.f32 3.1415927, %v362_v21  ;;  %v2102_v27 = vmul.f32 %v372_v16, %v363_v23  ;;  %v891_v44 = vperm.slane %v2071_v63, 5  ;;  %v898_v45 = vperm.slane %v2071_v63, 6 }
  0xc9   : > { %v2104_v28 = vmul.f32 %v372_v16, %v364_v24  ;;  %v982_v48 = vperm.slane %v2081_v13, 2  ;;  %v933_v49 = vperm.slane %v2079_v12, 3  ;;  %v1003_v50 = vperm.slane %v2081_v13, 5 }
  0xca   : > { %v2106_v29 = vmul.f32 %v372_v16, %v365_v26  ;;  %v376_v30 = vand.u32 2147483647, %v2102_v27  ;;  %v379_v31 = vand.u32 2139095040, %v2102_v27  ;;  %v954_v52 = vperm.slane %v2079_v12, 6 }
  0xcb   : > { %v530_v32 = vand.u32 2147483647, %v2104_v28  ;;  %v533_v33 = vand.u32 2139095040, %v2104_v28  ;;  %v975_v56 = vperm.slane %v2081_v13, 1  ;;  %v912_v57 = vperm.slane %v2079_v12, 0 }
  0xcc   : > { %v380_v35 = vshrl.u32 %v379_v31, 23  ;;  %v383_v36 = vand.u32 8388607, %v376_v30  ;;  %v687_v40 = vand.u32 2139095040, %v2106_v29  ;;  %v996_v59 = vperm.slane %v2081_v13, 4 }
  0xcd   : > { %875 = vperm.xlu2 %1782, %v870_v18   ;;  %945 = vperm.xlu0 %1783, %v940_v19   ;;  %v534_v38 = vshrl.u32 %v533_v33, 23  ;;  %v537_v39 = vand.u32 8388607, %v530_v32  ;;  %v926_v60 = vperm.slane %v2079_v12, 2  ;;  %v1017_v62 = vperm.slane %v2081_v13, 7 }
  0xce   : > { %910 = vperm.xlu1 %1781, %v905_v22   ;;  %v1679_v42 = vadd.s32 4294967169, %v380_v35  ;;  %v384_v43 = vor.u32 8388608, %v383_v36  ;;  %v688_v55 = vshrl.u32 %v687_v40, 23  ;;  %v947_v0 = vperm.slane %v2079_v12, 5 }
  0xcf   : > { %v1682_v46 = vadd.s32 4294967169, %v534_v38  ;;  %v538_v47 = vor.u32 8388608, %v537_v39  ;;  %v968_v3 = vperm.slane %v2081_v13, 0  ;;  %v1940_v14 = vmov 683565275  }
  0xd0   : > { %v386_v51 = vadd.s32 1, %v1679_v42  ;;  %v2126_v53 = vshll.u32 %v384_v43, 8  ;;  %v1685_v5 = vadd.s32 4294967169, %v688_v55  ;;  %v1941_v17 = vmov 2475754826  }
  0xd1   : > { %v540_v54 = vadd.s32 1, %v1682_v46  ;;  %v2130_v58 = vshll.u32 %v538_v47, 8  ;;  %v1942_v22 = vmov 2131351028   ;;  %v1943_v26 = vmov 2102212464  }
  0xd2   : > { %vm387_vm14 = vcmp.gt.s32.totalorder %v386_v51, 0  ;;  %v2138_v4 = vand.u32 65535, %v2126_v53  ;;  %v2141_v8 = vshrl.u32 %v2126_v53, 16  ;;  %v2167_v46 = vadd.s32 1, %v1685_v5 }
  0xd3   : > { %v388_v61 = vsel %vm387_vm14, %v386_v51, 0  ;;  %vm541_vm15 = vcmp.gt.s32.totalorder %v540_v54, 0  ;;  %v2146_v10 = vand.u32 65535, %v2130_v58  ;;  %v2153_v19 = vshrl.u32 %v2130_v58, 16 }
  0xd4   : > { %v390_v1 = vand.u32 31, %v388_v61  ;;  %v542_v2 = vsel %vm541_vm15, %v540_v54, 0  ;;  %v2148_v11 = vshrl.u32 %v388_v61, 5  ;;  %vm695_vm15 = vcmp.gt.s32.totalorder %v2167_v46, 0 }
  0xd5   : > { %889 = vperm.xlu2 %1782, %v884_v34   ;;  %966 = vperm.xlu0 %1783, %v961_v37   ;;  %v2143_v9 = vand.u32 31, %v542_v2  ;;  %v1944_v34 = vmov 920167782   ;;  %v1945_v37 = vmov 1326507024  }
  0xd6   : > { %924 = vperm.xlu1 %1781, %v919_v41   ;;  %v391_v7 = vsub.s32 32, %v390_v1  ;;  %v393_v16 = vshll.u32 %v1940_v14, %v390_v1  ;;  %v396_v18 = vshll.u32 %v1941_v17, %v390_v1  ;;  %v399_v24 = vshll.u32 %v1942_v22, %v390_v1 }
  0xd7   : > { %v402_v33 = vshll.u32 %v1943_v26, %v390_v1  ;;  %v405_v36 = vshll.u32 %v1944_v34, %v390_v1  ;;  %v2164_v42 = vsub.s32 32, %v2143_v9  ;;  %vm408_vm0 = vcmp.lt.s32.totalorder %v2148_v11, 1 }
  0xd8   : > { %v394_v21 = vshrl.u32 %v1941_v17, %v391_v7  ;;  %v397_v23 = vshrl.u32 %v1942_v22, %v391_v7  ;;  %v400_v31 = vshrl.u32 %v1943_v26, %v391_v7  ;;  %v403_v35 = vshrl.u32 %v1944_v34, %v391_v7 }
  0xd9   : > { %v406_v38 = vshrl.u32 %v1945_v37, %v391_v7  ;;  %vm409_vm1 = vcmp.lt.s32.totalorder %v2148_v11, 2  ;;  %vm411_vm2 = vcmp.lt.s32.totalorder %v2148_v11, 4  ;;  %vm410_vm3 = vcmp.lt.s32.totalorder %v2148_v11, 3 }
  0xda   : > { %v395_v39 = vor.u32 %v394_v21, %v393_v16  ;;  %v398_v40 = vor.u32 %v397_v23, %v396_v18  ;;  %v401_v41 = vor.u32 %v400_v31, %v399_v24  ;;  %v404_v43 = vor.u32 %v403_v35, %v402_v33 }
  0xdb   : > { %v548_v5 = vshrl.u32 %v1941_v17, %v2164_v42  ;;  %v2191_v18 = vshrl.u32 %v542_v2, 5  ;;  %v547_v21 = vshll.u32 %v1940_v14, %v2143_v9  ;;  %v550_v2 = vshll.u32 %v1941_v17, %v2143_v9 }
  0xdc   : > { %v416_v47 = vsel %vm408_vm0, %v395_v39, %v398_v40  ;;  %v417_v51 = vsel %vm411_vm2, %v404_v43, 920167782  ;;  %v413_v55 = vsel %vm411_vm2, %v401_v41, 2102212464 }
  0xdd   : > { %896 = vperm.xlu2 %1782, %v891_v44   ;;  %987 = vperm.xlu0 %1783, %v982_v48   ;;  %v407_v44 = vor.u32 %v406_v38, %v405_v36  ;;  %v420_v48 = vsel %vm408_vm0, %v398_v40, %v401_v41  ;;  %v418_v61 = vsel %vm410_vm3, %v401_v41, %v417_v51  ;;  %vm562_vm4 = vcmp.lt.s32.totalorder %v2191_v18, 1 }
  0xde   : > { %938 = vperm.xlu1 %1781, %v933_v49   ;;  %v392_v49 = vshrl.u32 %v1940_v14, %v391_v7  ;;  %v419_v7 = vsel %vm409_vm1, %v416_v47, %v418_v61  ;;  %v414_v31 = vsel %vm410_vm3, %v398_v40, %v413_v55  ;;  %v2201_v33 = vor.u32 %v548_v5, %v547_v21 }
  0xdf   : > { %v421_v54 = vsel %vm411_vm2, %v407_v44, 1326507024  ;;  %v450_v24 = vshrl.u32 %v419_v7, 16  ;;  %v553_v38 = vshll.u32 %v1942_v22, %v2143_v9  ;;  %vm565_vm9 = vcmp.lt.s32.totalorder %v2191_v18, 4 }
  0xe0   : > { %v422_v1 = vsel %vm410_vm3, %v404_v43, %v421_v54  ;;  %v554_v43 = vshrl.u32 %v1943_v26, %v2164_v42  ;;  %vm564_vm10 = vcmp.lt.s32.totalorder %v2191_v18, 3  ;;  %vm563_vm12 = vcmp.lt.s32.totalorder %v2191_v18, 2 }
  0xe1   : > { %v423_v16 = vsel %vm409_vm1, %v420_v48, %v422_v1  ;;  %v452_v41 = vmul.u32 %v450_v24, %v2138_v4 }
  0xe2   : > { %v427_v23 = vand.u32 65535, %v423_v16  ;;  %v428_v63 = vshrl.u32 %v423_v16, 16  ;;  %v1946_v16 = vmov 0  }
  0xe3   : > { %v455_v61 = vshll.u32 %v452_v41, 16 }
  0xe4   : > { %v430_v35 = vmul.u32 %v428_v63, %v2138_v4  ;;  %v431_v36 = vmul.u32 %v427_v23, %v2141_v8  ;;  %v432_v44 = vmul.u32 %v428_v63, %v2141_v8 }
  0xe5   : > { %903 = vperm.xlu2 %1782, %v898_v45   ;;  %1008 = vperm.xlu0 %1783, %v1003_v50   ;;  %v449_v45 = vand.u32 65535, %v419_v7  ;;  %v412_v50 = vsel %vm408_vm0, %v392_v49, %v395_v39  ;;  %v429_v39 = vmul.u32 %v427_v23, %v2138_v4  ;;  %v454_v49 = vmul.u32 %v450_v24, %v2141_v8 }
  0xe6   : > { %959 = vperm.xlu1 %1781, %v954_v52   ;;  %v551_v52 = vshrl.u32 %v1942_v22, %v2164_v42  ;;  %v433_v47 = vshll.u32 %v430_v35, 16  ;;  %v434_v51 = vshrl.u32 %v430_v35, 16  ;;  %v435_v54 = vshll.u32 %v431_v36, 16 }
  0xe7   : > { %v453_v40 = vmul.u32 %v449_v45, %v2141_v8  ;;  %v451_v48 = vmul.u32 %v449_v45, %v2138_v4  ;;  %v436_v55 = vshrl.u32 %v431_v36, 16  ;;  %v556_v4 = vshll.u32 %v1943_v26, %v2143_v9 }
  0xe8   : > { %vm437_vm5 = vc.u32 %v429_v39, %v433_v47  ;;  %v439_v1 = vadd.s32 %v433_v47, %v429_v39  ;;  %v552_v7 = vor.u32 %v551_v52, %v550_v2  ;;  %v557_v45 = vshrl.u32 %v1944_v34, %v2164_v42 }
  0xe9   : > { %v457_v5 = vshll.u32 %v453_v40, 16  ;;  %v438_v21 = vsel %vm437_vm5, 1, %v1946_v16  ;;  %vm459_vm6 = vc.u32 %v451_v48, %v455_v61  ;;  %v461_v23 = vadd.s32 %v455_v61, %v451_v48 }
  0xea   : > { %v440_v8 = vadd.s32 %v438_v21, %v432_v44  ;;  %vm441_vm7 = vc.u32 %v439_v1, %v435_v54  ;;  %v460_v63 = vsel %vm459_vm6, 1, %v1946_v16  ;;  %v456_v24 = vshrl.u32 %v452_v41, 16 }
  0xeb   : > { %v462_v2 = vadd.s32 %v460_v63, %v454_v49  ;;  %vm463_vm8 = vc.u32 %v461_v23, %v457_v5  ;;  %v555_v52 = vor.u32 %v554_v43, %v553_v38  ;;  %v558_v39 = vor.u32 %v557_v45, %v556_v4 }
  0xec   : > { %v464_v36 = vsel %vm463_vm8, 1, %v1946_v16  ;;  %v458_v47 = vshrl.u32 %v453_v40, 16  ;;  %v560_v44 = vshrl.u32 %v1945_v37, %v2164_v42  ;;  %v2236_v61 = vadd.s32 %v461_v23, %v457_v5 }
  0xed   : > { %917 = vperm.xlu2 %1782, %v912_v57   ;;  %v442_v57 = vsel %vm441_vm7, 1, %v1946_v16  ;;  %v466_v48 = vadd.s32 %v464_v36, %v462_v2  ;;  %v570_v41 = vsel %vm562_vm4, %v2201_v33, %v552_v7  ;;  %v571_v40 = vsel %vm565_vm9, %v558_v39, 920167782 }
  0xee   : > { %980 = vperm.xlu1 %1781, %v975_v56   ;;  %v444_v35 = vadd.s32 %v442_v57, %v440_v8  ;;  %v559_v56 = vshll.u32 %v1944_v34, %v2143_v9  ;;  %v572_v43 = vsel %vm564_vm10, %v555_v52, %v571_v40  ;;  %v415_v1 = vsel %vm409_vm1, %v412_v50, %v414_v31 }
  0xef   : > { %v467_v49 = vadd.s32 %v466_v48, %v456_v24  ;;  %v573_v21 = vsel %vm563_vm12, %v570_v41, %v572_v43  ;;  %v546_v23 = vshrl.u32 %v1940_v14, %v2164_v42  ;;  %v567_v31 = vsel %vm565_vm9, %v555_v52, 2102212464 }
  0xf0   : > { %v445_v54 = vadd.s32 %v444_v35, %v434_v51  ;;  %v561_v38 = vor.u32 %v560_v44, %v559_v56  ;;  %v574_v51 = vsel %vm562_vm4, %v552_v7, %v555_v52  ;;  %v603_v11 = vand.u32 65535, %v573_v21 }
  0xf1   : > { %v468_v5 = vadd.s32 %v467_v49, %v458_v47  ;;  %v604_v8 = vshrl.u32 %v573_v21, 16  ;;  %v684_v57 = vand.u32 2147483647, %v2106_v29  ;;  %v566_v42 = vsel %vm562_vm4, %v546_v23, %v2201_v33 }
  0xf2   : > { %v2245_v9 = vadd.s32 %v445_v54, %v436_v55  ;;  %v575_v55 = vsel %vm565_vm9, %v561_v38, 1326507024  ;;  %v607_v35 = vmul.u32 %v603_v11, %v2153_v19  ;;  %v568_v52 = vsel %vm564_vm10, %v552_v7, %v567_v31 }
  0xf3   : > { %v472_v50 = vadd.s32 1, %v468_v5  ;;  %v606_v2 = vmul.u32 %v604_v8, %v2146_v10  ;;  %v605_v47 = vmul.u32 %v603_v11, %v2146_v10  ;;  %v608_v48 = vmul.u32 %v604_v8, %v2153_v19 }
  0xf4   : > { %vm471_vm14 = vc.u32 %v2245_v9, %v2236_v61  ;;  %v611_v49 = vshll.u32 %v607_v35, 16  ;;  %v2298_v12 = vand.u32 8388607, %v684_v57  ;;  %v696_v23 = vsel %vm695_vm15, %v2167_v46, 0 }
  0xf5   : > { %931 = vperm.xlu2 %1782, %v926_v60   ;;  %v576_v60 = vsel %vm564_vm10, %v558_v39, %v575_v55  ;;  %v473_v24 = vsel %vm471_vm14, %v472_v50, %v468_v5  ;;  %v609_v56 = vshll.u32 %v606_v2, 16  ;;  %v610_v8 = vshrl.u32 %v606_v2, 16 }
  0xf6   : > { %1001 = vperm.xlu1 %1781, %v996_v59   ;;  %v577_v4 = vsel %vm563_vm12, %v574_v51, %v576_v60  ;;  %v469_v59 = vmul.u32 %v2126_v53, %v415_v1  ;;  %v692_v18 = vor.u32 8388608, %v2298_v12  ;;  %v697_v2 = vshrl.u32 %v696_v23, 5 }
  0xf7   : > { %v581_v63 = vand.u32 65535, %v577_v4  ;;  %v582_v45 = vshrl.u32 %v577_v4, 16  ;;  %vm613_vm0 = vc.u32 %v605_v47, %v609_v56  ;;  %v615_v38 = vadd.s32 %v609_v56, %v605_v47 }
  0xf8   : > { %v474_v36 = vadd.s32 %v473_v24, %v469_v59  ;;  %v614_v51 = vsel %vm613_vm0, 1, %v1946_v16  ;;  %v470_v4 = vadd.s32 %v2236_v61, %v2245_v9  ;;  %v698_v59 = vand.u32 31, %v696_v23 }
  0xf9   : > { %v584_v39 = vmul.u32 %v582_v45, %v2146_v10  ;;  %v585_v53 = vmul.u32 %v581_v63, %v2153_v19  ;;  %v583_v44 = vmul.u32 %v581_v63, %v2146_v10  ;;  %v586_v54 = vmul.u32 %v582_v45, %v2153_v19 }
  0xfa   : > { %v475_v33 = vadd.s32 536870912, %v474_v36  ;;  %v616_v19 = vadd.s32 %v614_v51, %v608_v48  ;;  %vm617_vm2 = vc.u32 %v615_v38, %v611_v49  ;;  %v2320_v9 = vadd.s32 %v615_v38, %v611_v49 }
  0xfb   : > { %v587_v41 = vshll.u32 %v584_v39, 16  ;;  %v589_v7 = vshll.u32 %v585_v53, 16  ;;  %v618_v55 = vsel %vm617_vm2, 1, %v1946_v16  ;;  %v588_v11 = vshrl.u32 %v584_v39, 16 }
  0xfc   : > { %v2292_v40 = vshrl.u32 %v475_v33, 30  ;;  %v620_v31 = vadd.s32 %v618_v55, %v616_v19  ;;  %v590_v46 = vshrl.u32 %v585_v53, 16  ;;  %v701_v39 = vshll.u32 %v1940_v14, %v698_v59 }
  0xfd   : > { %952 = vperm.xlu2 %1782, %v947_v0   ;;  %vm591_vm1 = vc.u32 %v583_v44, %v587_v41  ;;  %v593_v43 = vadd.s32 %v587_v41, %v583_v44  ;;  %v989_v0 = vperm.slane %v2081_v13, 3  ;;  %vm716_vm7 = vcmp.lt.s32.totalorder %v697_v2, 1 }
  0xfe   : > { %1022 = vperm.xlu1 %1781, %v1017_v62   ;;  %v592_v10 = vsel %vm591_vm1, 1, %v1946_v16  ;;  %v477_v1 = vshll.u32 %v2292_v40, 30  ;;  %v569_v62 = vsel %vm563_vm12, %v566_v42, %v568_v52  ;;  %v612_v42 = vshrl.u32 %v607_v35, 16 }
  0xff   : > { %v594_v5 = vadd.s32 %v592_v10, %v586_v54  ;;  %vm595_vm3 = vc.u32 %v593_v43, %v589_v7  ;;  %v623_v24 = vmul.u32 %v2130_v58, %v569_v62  ;;  %v699_v52 = vsub.s32 32, %v698_v59 }
 0x100   : > { %v596_v21 = vsel %vm595_vm3, 1, %v1946_v16  ;;  %v2309_v60 = vsub.s32 %v474_v36, %v477_v1  ;;  %v621_v36 = vadd.s32 %v620_v31, %v610_v8  ;;  %v704_v58 = vshll.u32 %v1941_v17, %v698_v59 }
 0x101   : > { %v598_v50 = vadd.s32 %v596_v21, %v594_v5  ;;  %v702_v33 = vshrl.u32 %v1941_v17, %v699_v52  ;;  %v707_v35 = vshll.u32 %v1942_v22, %v698_v59  ;;  %v708_v53 = vshrl.u32 %v1943_v26, %v699_v52 }
 0x102   : > { %vm479_vm4 = vcmp.lt.s32.totalorder %v2309_v60, 0  ;;  %v480_v63 = vsub.s32 0, %v2309_v60  ;;  %v622_v56 = vadd.s32 %v621_v36, %v612_v42  ;;  %v700_v41 = vshrl.u32 %v1940_v14, %v699_v52 }
 0x103   : > { %v599_v45 = vadd.s32 %v598_v50, %v588_v11  ;;  %v703_v7 = vor.u32 %v702_v33, %v701_v39  ;;  %v709_v38 = vor.u32 %v708_v53, %v707_v35  ;;  %v710_v43 = vshll.u32 %v1943_v26, %v698_v59 }
 0x104   : > { %v481_v61 = vsel %vm479_vm4, %v480_v63, %v2309_v60  ;;  %v626_v54 = vadd.s32 1, %v622_v56  ;;  %v711_v51 = vshrl.u32 %v1944_v34, %v699_v52  ;;  %v714_v1 = vshrl.u32 %v1945_v37, %v699_v52 }
 0x105   : > { %973 = vperm.xlu2 %1782, %v968_v3   ;;  %v482_v47 = vclz %v481_v61  ;;  %v2323_v48 = vadd.s32 %v599_v45, %v590_v46  ;;  %v705_v3 = vshrl.u32 %v1942_v22, %v699_v52  ;;  %v713_v22 = vshll.u32 %v1944_v34, %v698_v59 }
 0x106   : > { %v712_v21 = vor.u32 %v711_v51, %v710_v43  ;;  %vm717_vm8 = vcmp.lt.s32.totalorder %v697_v2, 2  ;;  %vm718_vm9 = vcmp.lt.s32.totalorder %v697_v2, 3  ;;  %vm719_vm10 = vcmp.lt.s32.totalorder %v697_v2, 4 }
 0x107   : > { %v1680_v44 = vadd.s32 4294967294, %v482_v47  ;;  %vm625_vm5 = vc.u32 %v2323_v48, %v2320_v9  ;;  %v706_v49 = vor.u32 %v705_v3, %v704_v58  ;;  %v715_v23 = vor.u32 %v714_v1, %v713_v22 }
 0x108   : > { %v627_v17 = vsel %vm625_vm5, %v626_v54, %v622_v56  ;;  %v720_v34 = vsel %vm716_vm7, %v700_v41, %v703_v7  ;;  %v721_v37 = vsel %vm719_vm10, %v709_v38, 2102212464  ;;  %v725_v31 = vsel %vm719_vm10, %v712_v21, 920167782 }
 0x109   : > { %vm1681_vm6 = vcmp.lt.s32.totalorder %v1680_v44, 0  ;;  %v628_v19 = vadd.s32 %v627_v17, %v623_v24  ;;  %v722_v59 = vsel %vm718_vm9, %v706_v49, %v721_v37  ;;  %v726_v63 = vsel %vm718_vm9, %v709_v38, %v725_v31 }
 0x10a   : > { %v485_v10 = vsel %vm1681_vm6, 0, %v1680_v44  ;;  %v2349_v24 = vsel %vm717_vm8, %v720_v34, %v722_v59  ;;  %v728_v36 = vsel %vm716_vm7, %v706_v49, %v709_v38  ;;  %v729_v52 = vsel %vm719_vm10, %v715_v23, 1326507024 }
 0x10b   : > { %v486_v5 = vsub.s32 32, %v485_v10  ;;  %v487_v14 = vshll.u32 %v2309_v60, %v485_v10  ;;  %v490_v62 = vsub.s32 4294967266, %v485_v10  ;;  %v629_v55 = vadd.s32 536870912, %v628_v19 }
 0x10c   : > { %v2358_v61 = vshll.u32 %v692_v18, 8  ;;  %v730_v47 = vsel %vm718_vm9, %v712_v21, %v729_v52  ;;  %vm2368_vm14 = vcmp.le.f32.partialorder %v376_v30, 0.7853982  ;;  %vm378_vm15 = vcmp.lt.s32.totalorder %v2102_v27, 0 }
 0x10d   : > { %994 = vperm.xlu2 %1782, %v989_v0   ;;  %v488_v26 = vshrl.u32 %v470_v4, %v486_v5  ;;  %v491_v11 = vadd.s32 127, %v490_v62  ;;  %v2339_v50 = vshrl.u32 %v629_v55, 30  ;;  %v724_v0 = vsel %vm716_vm7, %v703_v7, %v706_v49 }
 0x10e   : > { %v1010_v4 = vperm.slane %v2081_v13, 6  ;;  %v2352_v46 = vsel %vm717_vm8, %v724_v0, %v726_v63  ;;  %v731_v33 = vsel %vm717_vm8, %v728_v36, %v730_v47  ;;  %v733_v44 = vand.u32 65535, %v2358_v61 }
 0x10f   : > { %v489_v60 = vor.u32 %v488_v26, %v487_v14  ;;  %v492_v8 = vshll.u32 %v491_v11, 23  ;;  %v631_v45 = vshll.u32 %v2339_v50, 30  ;;  %v735_v35 = vand.u32 65535, %v731_v33 }
 0x110   : > { %v736_v54 = vshrl.u32 %v731_v33, 16  ;;  %v734_v12 = vshrl.u32 %v2358_v61, 16  ;;  %v757_v18 = vand.u32 65535, %v2352_v46  ;;  %v758_v7 = vshrl.u32 %v2352_v46, 16 }
 0x111   : > { %v493_v42 = vor.u32 4788187, %v492_v8  ;;  %v632_v39 = vsub.s32 %v628_v19, %v631_v45  ;;  %v496_v58 = vcvt.s32.f32 %v489_v60  ;;  %v500_v17 = vsub.s32 4, %v2292_v40 }
 0x112   : > { %v738_v43 = vmul.u32 %v736_v54, %v733_v44  ;;  %v739_v51 = vmul.u32 %v735_v35, %v734_v12  ;;  %v737_v19 = vmul.u32 %v735_v35, %v733_v44  ;;  %v624_v30 = vadd.s32 %v2320_v9, %v2323_v48 }
 0x113   : > { %v494_v56 = vand.u32 2147483647, %v493_v42  ;;  %vm633_vm12 = vcmp.lt.s32.totalorder %v632_v39, 0  ;;  %v634_v3 = vsub.s32 0, %v632_v39  ;;  %v759_v14 = vmul.u32 %v757_v18, %v733_v44 }
 0x114   : > { %v741_v1 = vshll.u32 %v738_v43, 16  ;;  %v2381_v62 = vmul.u32 %v758_v7, %v733_v44  ;;  %v740_v26 = vmul.u32 %v736_v54, %v734_v12  ;;  %v743_v11 = vshll.u32 %v739_v51, 16 }
 0x115   : > { %1015 = vperm.xlu2 %1782, %v1010_v4   ;;  %v497_v53 = vmul.f32 %v496_v58, %v494_v56  ;;  %v635_v41 = vsel %vm633_vm12, %v634_v3, %v632_v39  ;;  %v761_v60 = vmul.u32 %v757_v18, %v734_v12  ;;  %v742_v36 = vshrl.u32 %v738_v43, 16 }
 0x116   : > { %v636_v38 = vclz %v635_v41  ;;  %vm745_vm1 = vc.u32 %v737_v19, %v741_v1  ;;  %v747_v55 = vadd.s32 %v741_v1, %v737_v19  ;;  %v763_v9 = vshll.u32 %v2381_v62, 16 }
 0x117   : > { %v498_v49 = vxor.u32 2147483648, %v497_v53  ;;  %v746_v34 = vsel %vm745_vm1, 1, %v1946_v16  ;;  %v501_v47 = vsel %vm378_vm15, %v500_v17, %v2292_v40  ;;  %v744_v33 = vshrl.u32 %v739_v51, 16 }
 0x118   : > { %v1683_v10 = vadd.s32 4294967294, %v636_v38  ;;  %v748_v59 = vadd.s32 %v746_v34, %v740_v26  ;;  %vm749_vm2 = vc.u32 %v747_v55, %v743_v11  ;;  %vm767_vm3 = vc.u32 %v759_v14, %v763_v9 }
 0x119   : > { %v499_v22 = vsel %vm378_vm15, %v498_v49, %v497_v53  ;;  %v750_v45 = vsel %vm749_vm2, 1, %v1946_v16  ;;  %v762_v41 = vmul.u32 %v758_v7, %v734_v12  ;;  %v768_v18 = vsel %vm767_vm3, 1, %v1946_v16 }
 0x11a   : > { %v502_v5 = vsel %vm2368_vm14, %v2102_v27, %v499_v22  ;;  %vm1684_vm0 = vcmp.lt.s32.totalorder %v1683_v10, 0  ;;  %v752_v52 = vadd.s32 %v750_v45, %v748_v59  ;;  %v765_v38 = vshll.u32 %v761_v60, 16 }
 0x11b   : > { %v504_v21 = vmul.f32 %v502_v5, %v502_v5  ;;  %v639_v23 = vsel %vm1684_vm0, 0, %v1683_v10  ;;  %v769_v43 = vadd.s32 %v763_v9, %v759_v14  ;;  %v503_v22 = vsel %vm2368_vm14, 0, %v501_v47 }
 0x11c   : > { %v640_v31 = vsub.s32 32, %v639_v23  ;;  %v644_v8 = vsub.s32 4294967266, %v639_v23  ;;  %v641_v46 = vshll.u32 %v632_v39, %v639_v23  ;;  %v753_v53 = vadd.s32 %v752_v52, %v742_v36 }
 0x11d   : > { %v505_v37 = vmul.f32 -0.001358992, %v504_v21  ;;  %v512_v0 = vmul.f32 -0.00019511016, %v504_v21  ;;  %v770_v10 = vadd.s32 %v768_v18, %v762_v41  ;;  %vm771_vm4 = vc.u32 %v769_v43, %v765_v38 }
 0x11e   : > { %v642_v4 = vshrl.u32 %v624_v30, %v640_v31  ;;  %v645_v42 = vadd.s32 127, %v644_v8  ;;  %v754_v49 = vadd.s32 %v753_v53, %v744_v33  ;;  %v772_v55 = vsel %vm771_vm4, 1, %v1946_v16 }
 0x11f   : > { %v506_v48 = vadd.f32 0.041655596, %v505_v37  ;;  %v513_v63 = vadd.f32 0.008332121, %v512_v0  ;;  %v773_v12 = vadd.s32 %v769_v43, %v765_v38  ;;  %v520_v7 = vand.u32 3, %v503_v22  ;;  %v2408_v9 = vpop.permute.xlu2 %868 }
 0x120   : > { %v643_v3 = vor.u32 %v642_v4, %v641_v46  ;;  %v646_v35 = vshll.u32 %v645_v42, 23  ;;  %v764_v26 = vshrl.u32 %v2381_v62, 16  ;;  %v774_v11 = vadd.s32 %v772_v55, %v770_v10 }
 0x121   : > { %v507_v56 = vmul.f32 %v506_v48, %v504_v21  ;;  %v514_v58 = vmul.f32 %v513_v63, %v504_v21  ;;  %v2394_v2 = vadd.s32 %v773_v12, %v754_v49  ;;  %vm779_vm5 = vc.u32 %v754_v49, %v773_v12 }
 0x122   : > { %v647_v39 = vor.u32 4788187, %v646_v35  ;;  %v650_v19 = vcvt.s32.f32 %v643_v3  ;;  %v766_v37 = vshrl.u32 %v761_v60, 16  ;;  %v775_v0 = vadd.s32 %v774_v11, %v764_v26 }
 0x123   : > { %v508_v44 = vadd.f32 -0.4999988, %v507_v56  ;;  %v515_v54 = vadd.f32 -0.16666654, %v514_v58  ;;  %vm2398_vm6 = vcmp.le.f32.partialorder %v530_v32, 0.7853982  ;;  %vm519_vm12 = vweird.f32 %v2102_v27 }
 0x124   : > { %v648_v51 = vand.u32 2147483647, %v647_v39  ;;  %vm532_vm7 = vcmp.lt.s32.totalorder %v2104_v28, 0  ;;  %vm522_vm8 = vcmp.eq.s32.totalorder %v520_v7, 0  ;;  %vm525_vm9 = vcmp.eq.s32.totalorder %v520_v7, 2 }
 0x125   : > { %v509_v40 = vmul.f32 %v508_v44, %v504_v21  ;;  %v516_v17 = vmul.f32 %v515_v54, %v504_v21  ;;  %vm521_vm10 = vcmp.lt.s32.totalorder %v520_v7, 2  ;;  %v777_v36 = vmul.u32 %v2358_v61, %v2349_v24 }
 0x126   : > { %v651_v23 = vmul.f32 %v650_v19, %v648_v51  ;;  %v654_v33 = vsub.s32 4, %v2339_v50  ;;  %vm673_vm1 = vweird.f32 %v2104_v28  ;;  %vm2450_vm3 = vcmp.le.f32.partialorder %v684_v57, 0.7853982 }
 0x127   : > { %v510_v1 = vadd.f32 1.0, %v509_v40  ;;  %v517_v30 = vadd.f32 1.0, %v516_v17  ;;  %v2420_v61 = vpop.permute.xlu2 %875 }
 0x128   : > { %v652_v21 = vxor.u32 2147483648, %v651_v23  ;;  %v655_v24 = vsel %vm532_vm7, %v654_v33, %v2339_v50 }
 0x129   : > { %v518_v14 = vmul.f32 %v517_v30, %v502_v5  ;;  %v526_v34 = vxor.u32 2147483648, %v510_v1  ;;  %v776_v5 = vadd.s32 %v775_v0, %v766_v37  ;;  %v657_v20 = vsel %vm2398_vm6, 0, %v655_v24 }
 0x12a   : > { %v653_v16 = vsel %vm532_vm7, %v652_v21, %v651_v23  ;;  %v674_v19 = vand.u32 3, %v657_v20  ;;  %vm827_vm7 = vweird.f32 %v2106_v29 }
 0x12b   : > { %v523_v31 = vxor.u32 2147483648, %v518_v14  ;;  %v527_v59 = vsel %vm525_vm9, %v526_v34, %v518_v14  ;;  %v656_v60 = vsel %vm2398_vm6, %v2104_v28, %v653_v16  ;;  %v780_v4 = vadd.s32 1, %v776_v5 }
 0x12c   : > { %v658_v48 = vmul.f32 %v656_v60, %v656_v60  ;;  %vm679_vm14 = vcmp.eq.s32.totalorder %v674_v19, 2  ;;  %vm675_vm0 = vcmp.lt.s32.totalorder %v674_v19, 2  ;;  %vm849_vm9 = vcmp.gt.f32.partialorder %v2081_v13, 6.0  ;;  %v2482_v13 = vld [vmem:[%s2628_s2] ss:$0 sm:$0xff] }
 0x12d   : > { %v524_v62 = vsel %vm522_vm8, %v510_v1, %v523_v31  ;;  %v781_v52 = vsel %vm779_vm5, %v780_v4, %v776_v5 }
 0x12e   : > { %v528_v32 = vsel %vm521_vm10, %v524_v62, %v527_v59  ;;  %v659_v46 = vmul.f32 -0.001358992, %v658_v48  ;;  %v666_v42 = vmul.f32 -0.00019511016, %v658_v48  ;;  %v782_v3 = vadd.s32 %v781_v52, %v777_v36 }
 0x12f   : > { %v529_v63 = vsel %vm519_vm12, nan, %v528_v32  ;;  %v2427_v26 = vpop.permute.xlu2 %889  ;;  %vm1510_vm12 = vcmask 1041409  }
 0x130   : > { %v838_v45 = vadd.f32 1.0, %v529_v63  ;;  %v660_v56 = vadd.f32 0.041655596, %v659_v46  ;;  %v667_v58 = vadd.f32 0.008332121, %v666_v42  ;;  %v783_v49 = vadd.s32 536870912, %v782_v3 }
 0x132   : > { %v841_v47 = vmul.f32 0.5, %v838_v45  ;;  %v661_v35 = vmul.f32 %v660_v56, %v658_v48  ;;  %v668_v53 = vmul.f32 %v667_v58, %v658_v48  ;;  %v2424_v22 = vshrl.u32 %v783_v49, 30 }
 0x134   : > { %v853_v27 = vsel %vm2091_vm11, 0.0, %v841_v47  ;;  %v662_v18 = vadd.f32 -0.4999988, %v661_v35  ;;  %v669_v39 = vadd.f32 -0.16666654, %v668_v53  ;;  %v785_v50 = vshll.u32 %v2424_v22, 30 }
 0x135   : > { %v1147_v44 = vperm.slane %v853_v27, 0  ;;  %v1161_v54 = vperm.slane %v853_v27, 2  ;;  %v1154_v41 = vperm.slane %v853_v27, 1  ;;  %v1168_v10 = vperm.slane %v853_v27, 3 }
 0x136   : > { %v663_v38 = vmul.f32 %v662_v18, %v658_v48  ;;  %v670_v43 = vmul.f32 %v669_v39, %v658_v48  ;;  %v1182_v51 = vperm.slane %v853_v27, 5  ;;  %v1175_v1 = vperm.slane %v853_v27, 4 }
 0x137   : > { %1152 = vperm.xlu0 %1783, %v1147_v44   ;;  %1166 = vperm.xlu1 %1781, %v1161_v54   ;;  %v786_v12 = vsub.s32 %v782_v3, %v785_v50  ;;  %vm676_vm11 = vcmp.eq.s32.totalorder %v674_v19, 0  ;;  %v1189_v31 = vperm.slane %v853_v27, 6  ;;  %v1196_v16 = vperm.slane %v853_v27, 7  ;;  %v2435_v28 = vpop.permute.xlu2 %896 }
 0x138   : > { %1159 = vperm.xlu2 %1782, %v1154_v41   ;;  %v664_v40 = vadd.f32 1.0, %v663_v38  ;;  %v671_v17 = vadd.f32 1.0, %v670_v43  ;;  %v2446_v44 = vpop.permute.xlu1 %861  ;;  %v808_v39 = vsub.s32 4, %v2424_v22 }
 0x139   : > { %vm787_vm15 = vcmp.lt.s32.totalorder %v786_v12, 0  ;;  %v788_v23 = vsub.s32 0, %v786_v12 }
 0x13a   : > { %v672_v30 = vmul.f32 %v671_v17, %v656_v60  ;;  %v680_v55 = vxor.u32 2147483648, %v664_v40 }
 0x13b   : > { %v789_v21 = vsel %vm787_vm15, %v788_v23, %v786_v12  ;;  %vm1516_vm15 = vcmask 1044484  }
 0x13c   : > { %v677_v7 = vxor.u32 2147483648, %v672_v30  ;;  %v681_v14 = vsel %vm679_vm14, %v680_v55, %v672_v30  ;;  %v790_v0 = vclz %v789_v21  ;;  %vm1514_vm14 = vcmask 1043459  }
 0x13e   : > { %v678_v11 = vsel %vm676_vm11, %v664_v40, %v677_v7  ;;  %v1686_v5 = vadd.s32 4294967294, %v790_v0  ;;  %vm1512_vm11 = vcmask 1042434  }
 0x13f   : > { %1173 = vperm.xlu0 %1783, %v1168_v10   ;;  %1187 = vperm.xlu1 %1781, %v1182_v51   ;;  %v682_v34 = vsel %vm675_vm0, %v678_v11, %v681_v14  ;;  %v2442_v27 = vpop.permute.xlu2 %903  ;;  %vm1518_vm0 = vcmask 1045509  }
 0x140   : > { %1180 = vperm.xlu2 %1782, %v1175_v1   ;;  %v683_v37 = vsel %vm673_vm1, nan, %v682_v34  ;;  %vm1687_vm2 = vcmp.lt.s32.totalorder %v1686_v5, 0  ;;  %v2461_v51 = vpop.permute.xlu1 %910  ;;  %vm1520_vm1 = vcmask 1046534  }
 0x141   : > { %v839_v8 = vadd.f32 1.0, %v683_v37  ;;  %v793_v60 = vsel %vm1687_vm2, 0, %v1686_v5  ;;  %v354_v37 = vadd.s32 16, %v2065_v15  ;;  %vm1522_vm2 = vcmask 1047559  }
 0x142   : > { %v794_v48 = vsub.s32 32, %v793_v60  ;;  %v798_v4 = vsub.s32 4294967266, %v793_v60  ;;  %v795_v46 = vshll.u32 %v786_v12, %v793_v60 }
 0x143   : > { %v842_v62 = vmul.f32 0.5, %v839_v8  ;;  %vm846_vm8 = vcmp.eq.s32.totalorder %v354_v37, %v2076_v6 }
 0x144   : > { %v796_v42 = vshrl.u32 %v2394_v2, %v794_v48  ;;  %v799_v36 = vadd.s32 127, %v798_v4  ;;  %vm852_vm10 = vmor %vm846_vm8, %vm849_vm9  ;;  %v883_v4 = vpop.permute.xlu0 %882 }
 0x145   : > { %v2432_v59 = vsel %vm2098_vm13, 0.0, %v842_v62  ;;  %vm686_vm13 = vcmp.lt.s32.totalorder %v2106_v29, 0 }
 0x146   : > { %v1203_v32 = vperm.slane %v2432_v59, 0  ;;  %v1210_v63 = vperm.slane %v2432_v59, 1  ;;  %v1217_v45 = vperm.slane %v2432_v59, 2  ;;  %v797_v25 = vor.u32 %v796_v42, %v795_v46 }
 0x147   : > { %1194 = vperm.xlu0 %1783, %v1189_v31   ;;  %v800_v52 = vshll.u32 %v799_v36, 23  ;;  %v1224_v47 = vperm.slane %v2432_v59, 3  ;;  %v1231_v58 = vperm.slane %v2432_v59, 4  ;;  %v1238_v35 = vperm.slane %v2432_v59, 5  ;;  %v2458_v38 = vpop.permute.xlu2 %917 }
 0x148   : > { %1201 = vperm.xlu2 %1782, %v1196_v16   ;;  %1208 = vperm.xlu1 %1781, %v1203_v32   ;;  %v804_v3 = vcvt.s32.f32 %v797_v25  ;;  %v809_v17 = vsel %vm686_vm13, %v808_v39, %v2424_v22  ;;  %v2468_v0 = vpop.permute.xlu1 %924 }
 0x149   : > { %v801_v56 = vor.u32 4788187, %v800_v52  ;;  %v811_v19 = vsel %vm2450_vm3, 0, %v809_v17  ;;  %v1028_v52 = vsub.f32 %v2408_v9, %v2482_v13  ;;  %v1031_v9 = vsub.f32 %v2427_v26, %v2482_v13 }
 0x14a   : > { %v828_v12 = vand.u32 3, %v811_v19  ;;  %v1030_v19 = vsub.f32 %v883_v4, %v2482_v13 }
 0x14b   : > { %v802_v33 = vand.u32 2147483647, %v801_v56  ;;  %v1252_v56 = vperm.slane %v2432_v59, 7  ;;  %v1055_v39 = vmul.f32 %v1031_v9, %v1031_v9 }
 0x14c   : > { %vm833_vm4 = vcmp.eq.s32.totalorder %v828_v12, 2  ;;  %vm830_vm5 = vcmp.eq.s32.totalorder %v828_v12, 0  ;;  %vm829_vm6 = vcmp.lt.s32.totalorder %v828_v12, 2  ;;  %v2484_v36 = vpop.permute.xlu0 %945 }
 0x14d   : > { %v805_v53 = vmul.f32 %v804_v3, %v802_v33  ;;  %v1052_v3 = vmul.f32 %v1028_v52, %v1028_v52  ;;  %v1079_v17 = vmul.f32 -4.0, %v1055_v39  ;;  %v1036_v39 = vsub.f32 %v2468_v0, %v2482_v13 }
 0x14f   : > { %1215 = vperm.xlu0 %1783, %v1210_v63   ;;  %v806_v2 = vxor.u32 2147483648, %v805_v53  ;;  %v2465_v11 = vpop.permute.xlu2 %931 }
 0x150   : > { %1222 = vperm.xlu2 %1782, %v1217_v45   ;;  %1229 = vperm.xlu1 %1781, %v1224_v47   ;;  %v2475_v45 = vpop.permute.xlu1 %938  ;;  %v1245_v47 = vperm.slane %v2432_v59, 6  ;;  %v1029_v59 = vsub.f32 %v2420_v61, %v2482_v13 }
 0x151   : > { %v807_v41 = vsel %vm686_vm13, %v806_v2, %v805_v53  ;;  %v1076_v2 = vmul.f32 -4.0, %v1052_v3 }
 0x152   : > { %v810_v24 = vsel %vm2450_vm3, %v2106_v29, %v807_v41 }
 0x153   : > { %v812_v18 = vmul.f32 %v810_v24, %v810_v24  ;;  %v1101_v41 = vmul.f32 1.442695, %v1076_v2 }
 0x155   : > { %v813_v49 = vmul.f32 -0.001358992, %v812_v18  ;;  %v820_v20 = vmul.f32 -0.00019511016, %v812_v18  ;;  %1793 = vpow2.f32 %v1101_v41 }
 0x157   : > { %1236 = vperm.xlu0 %1783, %v1231_v58   ;;  %v814_v43 = vadd.f32 0.041655596, %v813_v49  ;;  %v821_v40 = vadd.f32 0.008332121, %v820_v20  ;;  %v2473_v60 = vpop.permute.xlu2 %952  ;;  %v1053_v49 = vmul.f32 %v1029_v59, %v1029_v59 }
 0x158   : > { %1243 = vperm.xlu2 %1782, %v1238_v35   ;;  %v2486_v25 = vpop.permute.xlu1 %959  ;;  %v2494_v35 = vpop.permute.xlu0 %966 }
 0x159   : > { %v815_v57 = vmul.f32 %v814_v43, %v812_v18  ;;  %v822_v10 = vmul.f32 %v821_v40, %v812_v18  ;;  %v1077_v26 = vmul.f32 -4.0, %v1053_v49 }
 0x15b   : > { %v816_v50 = vadd.f32 -0.4999988, %v815_v57  ;;  %v823_v1 = vadd.f32 -0.16666654, %v822_v10  ;;  %v1794_v61 = vpop.eup %1793 }
 0x15d   : > { %v817_v30 = vmul.f32 %v816_v50, %v812_v18  ;;  %v824_v55 = vmul.f32 %v823_v1, %v812_v18  ;;  %v1027_v18 = vsub.f32 %v2446_v44, %v2482_v13  ;;  %v1107_v50 = vmul.f32 1.442695, %v1079_v17 }
 0x15e   : > { %v1032_v1 = vsub.f32 %v2435_v28, %v2482_v13 }
 0x15f   : > { %v818_v7 = vadd.f32 1.0, %v817_v30  ;;  %v825_v23 = vadd.f32 1.0, %v824_v55  ;;  %v2477_v29 = vpop.permute.xlu2 %973  ;;  %v1051_v20 = vmul.f32 %v1027_v18, %v1027_v18  ;;  %v1103_v30 = vmul.f32 1.442695, %v1077_v26 }
 0x160   : > { %v2496_v53 = vpop.permute.xlu1 %980  ;;  %v2506_v43 = vpop.permute.xlu0 %987  ;;  %v1034_v55 = vsub.f32 %v2461_v51, %v2482_v13  ;;  %1795 = vpow2.f32 %v1107_v50  ;;  %v1033_v51 = vsub.f32 %v2442_v27, %v2482_v13 }
 0x161   : > { %v826_v14 = vmul.f32 %v825_v23, %v810_v24  ;;  %v834_v34 = vxor.u32 2147483648, %v818_v7  ;;  %v1075_v10 = vmul.f32 -4.0, %v1051_v20  ;;  %v1056_v23 = vmul.f32 %v1032_v1, %v1032_v1 }
 0x162   : > { %1797 = vpow2.f32 %v1103_v30 }
 0x163   : > { %v831_v22 = vxor.u32 2147483648, %v826_v14  ;;  %v835_v21 = vsel %vm833_vm4, %v834_v34, %v826_v14  ;;  %v1099_v12 = vmul.f32 1.442695, %v1075_v10  ;;  %v1080_v28 = vmul.f32 -4.0, %v1056_v23 }
 0x165   : > { %v832_v31 = vsel %vm830_vm5, %v818_v7, %v831_v22  ;;  %v1054_v7 = vmul.f32 %v1030_v19, %v1030_v19  ;;  %1799 = vpow2.f32 %v1099_v12 }
 0x166   : > { %v836_v8 = vsel %vm829_vm6, %v832_v31, %v835_v21  ;;  %v1058_v21 = vmul.f32 %v1034_v55, %v1034_v55 }
 0x167   : > { %v837_v16 = vsel %vm827_vm7, nan, %v836_v8  ;;  %v2492_v58 = vpop.permute.xlu2 %994  ;;  %v1078_v37 = vmul.f32 -4.0, %v1054_v7 }
 0x168   : > { %v840_v5 = vadd.f32 1.0, %v837_v16  ;;  %v2508_v40 = vpop.permute.xlu1 %1001  ;;  %v2515_v14 = vpop.permute.xlu0 %1008 }
 0x169   : > { %v1796_v16 = vpop.eup %1795 }
 0x16a   : > { %v843_v62 = vmul.f32 0.5, %v840_v5  ;;  %v1082_v5 = vmul.f32 -4.0, %v1058_v21 }
 0x16c   : > { %v855_v32 = vsel %vm852_vm10, 0.0, %v843_v62  ;;  %v1105_v62 = vmul.f32 1.442695, %v1078_v37 }
 0x16d   : > { %v1259_v15 = vperm.slane %v855_v32, 0  ;;  %v1273_v48 = vperm.slane %v855_v32, 2  ;;  %v1266_v63 = vperm.slane %v855_v32, 1  ;;  %v1280_v46 = vperm.slane %v855_v32, 3 }
 0x16e   : > { %v1294_v6 = vperm.slane %v855_v32, 5  ;;  %v1287_v42 = vperm.slane %v855_v32, 4  ;;  %v1301_v33 = vperm.slane %v855_v32, 6  ;;  %v1308_v54 = vperm.slane %v855_v32, 7 }
 0x16f   : > { %1264 = vperm.xlu1 %1781, %v1259_v15   ;;  %1278 = vperm.xlu2 %1782, %v1273_v48   ;;  %v2502_v24 = vpop.permute.xlu2 %1015  ;;  %v1035_v32 = vsub.f32 %v2458_v38, %v2482_v13  ;;  %v1037_v15 = vsub.f32 %v2465_v11, %v2482_v13  ;;  %1801 = vpow2.f32 %v1105_v62 }
 0x170   : > { %1271 = vperm.xlu0 %1783, %v1266_v63   ;;  %v2517_v34 = vpop.permute.xlu1 %1022  ;;  %v1798_v63 = vpop.eup %1797 }
 0x171   : > { %v1800_v4 = vpop.eup %1799  ;;  %v1059_v27 = vmul.f32 %v1035_v32, %v1035_v32  ;;  %v1061_v2 = vmul.f32 %v1037_v15, %v1037_v15 }
 0x173   : > { %v1083_v49 = vmul.f32 -4.0, %v1059_v27  ;;  %v1085_v20 = vmul.f32 -4.0, %v1061_v2 }
 0x175   : > { %v1802_v19 = vpop.eup %1801  ;;  %v1115_v0 = vmul.f32 1.442695, %v1083_v49  ;;  %v1119_v21 = vmul.f32 1.442695, %v1085_v20 }
 0x177   : > { %1285 = vperm.xlu1 %1781, %v1280_v46   ;;  %1299 = vperm.xlu2 %1782, %v1294_v6   ;;  %v1109_v46 = vmul.f32 1.442695, %v1080_v28 }
 0x178   : > { %1292 = vperm.xlu0 %1783, %v1287_v42  }
 0x179   : > { %1803 = vpow2.f32 %v1109_v46 }
 0x17f   : > { %1250 = vperm.xlu1 %1781, %v1245_v47   ;;  %1257 = vperm.xlu2 %1782, %v1252_v56   ;;  %v1057_v47 = vmul.f32 %v1033_v51, %v1033_v51  ;;  %v1113_v56 = vmul.f32 1.442695, %v1082_v5  ;;  %v1804_v23 = vpop.eup %1803 }
 0x180   : > { %1306 = vperm.xlu0 %1783, %v1301_v33  }
 0x181   : > { %v1081_v11 = vmul.f32 -4.0, %v1057_v47  ;;  %1805 = vpow2.f32 %v1113_v56 }
 0x182   : > { %1807 = vpow2.f32 %v1119_v21 }
 0x183   : > { %v1111_v30 = vmul.f32 1.442695, %v1081_v11 }
 0x185   : > { %1809 = vpow2.f32 %v1111_v30 }
 0x186   : > { %1811 = vpow2.f32 %v1115_v0 }
 0x187   : > { %1313 = vperm.xlu1 %1781, %v1308_v54  }
 0x192   : > { %v1160_v57 = vpop.permute.xlu2 %1159 }
 0x193   : > { %v1316_v44 = vmul.f32 %v1794_v61, %v1160_v57  ;;  %v1038_v61 = vsub.f32 %v2475_v45, %v2482_v13 }
 0x195   : > { %v1348_v22 = vrot.slane %v1316_v44, 4  ;;  %v1062_v5 = vmul.f32 %v1038_v61, %v1038_v61 }
 0x197   : > { %v1349_v8 = vadd.f32 %v1348_v22, %v1316_v44  ;;  %v1060_v22 = vmul.f32 %v1036_v39, %v1036_v39  ;;  %v1086_v47 = vmul.f32 -4.0, %v1062_v5 }
 0x199   : > { %v1350_v6 = vrot.slane %v1349_v8, 2  ;;  %v1121_v11 = vmul.f32 1.442695, %v1086_v47 }
 0x19a   : > { %v1181_v31 = vpop.permute.xlu2 %1180 }
 0x19b   : > { %v1319_v48 = vmul.f32 %v1796_v16, %v1181_v31  ;;  %v1351_v41 = vadd.f32 %v1350_v6, %v1349_v8  ;;  %v1806_v31 = vpop.eup %1805 }
 0x19d   : > { %v1366_v54 = vrot.slane %v1319_v48, 4  ;;  %v1352_v50 = vrot.slane %v1351_v41, 1 }
 0x19f   : > { %v1367_v17 = vadd.f32 %v1366_v54, %v1319_v48  ;;  %v1353_v62 = vadd.f32 %v1352_v50, %v1351_v41  ;;  %v1808_v41 = vpop.eup %1807 }
 0x1a0   : > { %v1810_v49 = vpop.eup %1809 }
 0x1a1   : > { %v1368_v37 = vrot.slane %v1367_v17, 2 }
 0x1a2   : > { %v1202_v26 = vpop.permute.xlu2 %1201 }
 0x1a3   : > { %v1322_v45 = vmul.f32 %v1806_v31, %v1202_v26  ;;  %v1812_v26 = vpop.eup %1811 }
 0x1a9   : > { %v1167_v42 = vpop.permute.xlu1 %1166  ;;  %v1153_v52 = vpop.permute.xlu0 %1152 }
 0x1aa   : > { %v1317_v33 = vmul.f32 %v1798_v63, %v1167_v42  ;;  %v1315_v3 = vmul.f32 %v1800_v4, %v1153_v52  ;;  %v1040_v63 = vsub.f32 %v2473_v60, %v2482_v13  ;;  %v1369_v4 = vadd.f32 %v1368_v37, %v1367_v17  ;;  %v1223_v54 = vpop.permute.xlu2 %1222 }
 0x1ab   : > { %v1084_v52 = vmul.f32 -4.0, %v1060_v22 }
 0x1ac   : > { %v1354_v9 = vrot.slane %v1317_v33, 4  ;;  %v1342_v38 = vrot.slane %v1315_v3, 4  ;;  %v1064_v27 = vmul.f32 %v1040_v63, %v1040_v63  ;;  %v1370_v2 = vrot.slane %v1369_v4, 1 }
 0x1ad   : > { %v1117_v60 = vmul.f32 1.442695, %v1084_v52 }
 0x1ae   : > { %v1355_v59 = vadd.f32 %v1354_v9, %v1317_v33  ;;  %v1343_v18 = vadd.f32 %v1342_v38, %v1315_v3  ;;  %v1384_v33 = vrot.slane %v1322_v45, 4  ;;  %v1088_v20 = vmul.f32 -4.0, %v1064_v27 }
 0x1af   : > { %v1371_v17 = vadd.f32 %v1370_v2, %v1369_v4  ;;  %1813 = vpow2.f32 %v1117_v60 }
 0x1b0   : > { %v1356_v57 = vrot.slane %v1355_v59, 2  ;;  %v1344_v10 = vrot.slane %v1343_v18, 2  ;;  %1815 = vpow2.f32 %v1121_v11 }
 0x1b1   : > { %v1188_v1 = vpop.permute.xlu1 %1187  ;;  %v1174_v44 = vpop.permute.xlu0 %1173 }
 0x1b2   : > { %v1357_v55 = vadd.f32 %v1356_v57, %v1355_v59  ;;  %v1345_v12 = vadd.f32 %v1344_v10, %v1343_v18  ;;  %v1318_v7 = vmul.f32 %v1802_v19, %v1174_v44  ;;  %v1320_v16 = vmul.f32 %v1804_v23, %v1188_v1  ;;  %v1244_v52 = vpop.permute.xlu2 %1243 }
 0x1b3   : > { %v1385_v59 = vadd.f32 %v1384_v33, %v1322_v45  ;;  %v1325_v18 = vmul.f32 %v1808_v41, %v1223_v54  ;;  %v1039_v57 = vsub.f32 %v2484_v36, %v2482_v13 }
 0x1b4   : > { %v1358_v28 = vrot.slane %v1357_v55, 1  ;;  %v1346_v8 = vrot.slane %v1345_v12, 1  ;;  %v1360_v51 = vrot.slane %v1318_v7, 4  ;;  %v1372_v6 = vrot.slane %v1320_v16, 4 }
 0x1b5   : > { %v1063_v0 = vmul.f32 %v1039_v57, %v1039_v57 }
 0x1b6   : > { %v1359_v32 = vadd.f32 %v1358_v28, %v1357_v55  ;;  %v1347_v15 = vadd.f32 %v1346_v8, %v1345_v12  ;;  %v1361_v48 = vadd.f32 %v1360_v51, %v1318_v7  ;;  %v1373_v9 = vadd.f32 %v1372_v6, %v1320_v16  ;;  %v1814_v8 = vpop.eup %1813 }
 0x1b7   : > { %v1386_v55 = vrot.slane %v1385_v59, 2  ;;  %v1402_v12 = vrot.slane %v1325_v18, 4  ;;  %v1125_v7 = vmul.f32 1.442695, %v1088_v20  ;;  %v1816_v51 = vpop.eup %1815  ;;  %v1087_v5 = vmul.f32 -4.0, %v1063_v0 }
 0x1b8   : > { %v1511_v46 = vsel %vm1510_vm12, %v1353_v62, %v1347_v15  ;;  %v1362_v42 = vrot.slane %v1361_v48, 2  ;;  %v1374_v10 = vrot.slane %v1373_v9, 2 }
 0x1b9   : > { %v1513_v56 = vsel %vm1512_vm11, %v1359_v32, %v1511_v46  ;;  %v1195_v50 = vpop.permute.xlu0 %1194  ;;  %v1387_v31 = vadd.f32 %v1386_v55, %v1385_v59  ;;  %v1403_v28 = vadd.f32 %v1402_v12, %v1325_v18  ;;  %1817 = vpow2.f32 %v1125_v7 }
 0x1ba   : > { %v1363_v3 = vadd.f32 %v1362_v42, %v1361_v48  ;;  %v1209_v61 = vpop.permute.xlu1 %1208  ;;  %v1321_v30 = vmul.f32 %v1810_v49, %v1195_v50  ;;  %v1375_v21 = vadd.f32 %v1374_v10, %v1373_v9  ;;  %v1045_v46 = vsub.f32 %v2506_v43, %v2482_v13  ;;  %v1339_v43 = vld [vmem:[#allocation2 + $0x10] sm:$0xff] }
 0x1bb   : > { %v1323_v44 = vmul.f32 %v1812_v26, %v1209_v61  ;;  %v1388_v6 = vrot.slane %v1387_v31, 1  ;;  %v1404_v42 = vrot.slane %v1403_v28, 2  ;;  %v1043_v7 = vsub.f32 %v2477_v29, %v2482_v13 }
 0x1bc   : > { %v1364_v38 = vrot.slane %v1363_v3, 1  ;;  %v1378_v22 = vrot.slane %v1321_v30, 4  ;;  %v1376_v62 = vrot.slane %v1375_v21, 1 }
 0x1bd   : > { %v1390_v23 = vrot.slane %v1323_v44, 4  ;;  %v1389_v60 = vadd.f32 %v1388_v6, %v1387_v31  ;;  %v1405_v11 = vadd.f32 %v1404_v42, %v1403_v28  ;;  %v1067_v29 = vmul.f32 %v1043_v7, %v1043_v7 }
 0x1be   : > { %v1365_v39 = vadd.f32 %v1364_v38, %v1363_v3  ;;  %v1379_v36 = vadd.f32 %v1378_v22, %v1321_v30  ;;  %v1123_v3 = vmul.f32 1.442695, %v1087_v5  ;;  %v1377_v27 = vadd.f32 %v1376_v62, %v1375_v21 }
 0x1bf   : > { %v1391_v37 = vadd.f32 %v1390_v23, %v1323_v44  ;;  %v1818_v2 = vpop.eup %1817  ;;  %v1406_v50 = vrot.slane %v1405_v11, 1  ;;  %v1091_v6 = vmul.f32 -4.0, %v1067_v29 }
 0x1c0   : > { %v1515_v19 = vsel %vm1514_vm14, %v1365_v39, %v1513_v56  ;;  %v1380_v16 = vrot.slane %v1379_v36, 2  ;;  %v1328_v59 = vmul.f32 %v1818_v2, %v1244_v52  ;;  %v1069_v39 = vmul.f32 %v1045_v46, %v1045_v46 }
 0x1c1   : > { %v1517_v1 = vsel %vm1516_vm15, %v1371_v17, %v1515_v19  ;;  %v1216_v32 = vpop.permute.xlu0 %1215  ;;  %v1392_v15 = vrot.slane %v1391_v37, 2  ;;  %1819 = vpow2.f32 %v1123_v3  ;;  %v1407_v0 = vadd.f32 %v1406_v50, %v1405_v11 }
 0x1c2   : > { %v1230_v45 = vpop.permute.xlu1 %1229  ;;  %v1381_v48 = vadd.f32 %v1380_v16, %v1379_v36  ;;  %v1324_v4 = vmul.f32 %v1814_v8, %v1216_v32  ;;  %v1519_v18 = vsel %vm1518_vm0, %v1377_v27, %v1517_v1  ;;  %v1420_v44 = vrot.slane %v1328_v59, 4 }
 0x1c3   : > { %v1326_v63 = vmul.f32 %v1816_v51, %v1230_v45  ;;  %v1393_v54 = vadd.f32 %v1392_v15, %v1391_v37  ;;  %v1093_v30 = vmul.f32 -4.0, %v1069_v39  ;;  %v1044_v1 = vsub.f32 %v2496_v53, %v2482_v13 }
 0x1c4   : > { %v1382_v47 = vrot.slane %v1381_v48, 1  ;;  %v1396_v33 = vrot.slane %v1324_v4, 4  ;;  %v1421_v21 = vadd.f32 %v1420_v44, %v1328_v59  ;;  %v1042_v8 = vsub.f32 %v2494_v35, %v2482_v13 }
 0x1c5   : > { %v1408_v56 = vrot.slane %v1326_v63, 4  ;;  %v1394_v57 = vrot.slane %v1393_v54, 1  ;;  %v1135_v37 = vmul.f32 1.442695, %v1093_v30  ;;  %v1068_v16 = vmul.f32 %v1044_v1, %v1044_v1 }
 0x1c6   : > { %v1383_v9 = vadd.f32 %v1382_v47, %v1381_v48  ;;  %v1397_v41 = vadd.f32 %v1396_v33, %v1324_v4  ;;  %v1048_v53 = vsub.f32 %v2515_v14, %v2482_v13  ;;  %v1422_v32 = vrot.slane %v1421_v21, 2 }
 0x1c7   : > { %v1409_v38 = vadd.f32 %v1408_v56, %v1326_v63  ;;  %v1395_v23 = vadd.f32 %v1394_v57, %v1393_v54  ;;  %v1820_v28 = vpop.eup %1819  ;;  %1821 = vpow2.f32 %v1135_v37  ;;  %v1066_v63 = vmul.f32 %v1042_v8, %v1042_v8 }
 0x1c8   : > { %v1521_v49 = vsel %vm1520_vm1, %v1383_v9, %v1519_v18  ;;  %v1398_v17 = vrot.slane %v1397_v41, 2  ;;  %v1092_v4 = vmul.f32 -4.0, %v1068_v16  ;;  %v1072_v46 = vmul.f32 %v1048_v53, %v1048_v53 }
 0x1c9   : > { %v1410_v20 = vrot.slane %v1409_v38, 2  ;;  %v1523_v26 = vsel %vm1522_vm2, %v1389_v60, %v1521_v49  ;;  %v1237_v5 = vpop.permute.xlu0 %1236  ;;  %v1279_v15 = vpop.permute.xlu2 %1278  ;;  %v1046_v35 = vsub.f32 %v2492_v58, %v2482_v13  ;;  %v1047_v52 = vsub.f32 %v2508_v40, %v2482_v13 }
 0x1ca   : > { %v1541_v10 = vadd.f32 %v1523_v26, %v1339_v43  ;;  %v1399_v61 = vadd.f32 %v1398_v17, %v1397_v41  ;;  %v1327_v45 = vmul.f32 %v1820_v28, %v1237_v5  ;;  %v1423_v14 = vadd.f32 %v1422_v32, %v1421_v21 }
 0x1cb   : > { %v1411_v19 = vadd.f32 %v1410_v20, %v1409_v38  ;;  %v1090_v56 = vmul.f32 -4.0, %v1066_v63  ;;  %v1133_v33 = vmul.f32 1.442695, %v1092_v4  ;;  %v1096_v27 = vmul.f32 -4.0, %v1072_v46 }
 0x1cc   : > { %1544 = vst [vmem:[#allocation2 + $0x10] sm:$0xff] %v1541_v10  ;;  %v1400_v12 = vrot.slane %v1399_v61, 1  ;;  %v1414_v48 = vrot.slane %v1327_v45, 4  ;;  %v1131_v2 = vmul.f32 1.442695, %v1091_v6  ;;  %v1070_v54 = vmul.f32 %v1046_v35, %v1046_v35 }
 0x1cd   : > { %v1412_v55 = vrot.slane %v1411_v19, 1  ;;  %v1822_v3 = vpop.eup %1821  ;;  %v1071_v38 = vmul.f32 %v1047_v52, %v1047_v52  ;;  %v1424_v41 = vrot.slane %v1423_v14, 1  ;;  %v1129_v59 = vmul.f32 1.442695, %v1090_v56 }
 0x1ce   : > { %v1401_v22 = vadd.f32 %v1400_v12, %v1399_v61  ;;  %v1415_v42 = vadd.f32 %v1414_v48, %v1327_v45  ;;  %v1333_v60 = vmul.f32 %v1822_v3, %v1279_v15  ;;  %v1041_v58 = vsub.f32 %v2486_v25, %v2482_v13 }
 0x1cf   : > { %v1413_v36 = vadd.f32 %v1412_v55, %v1411_v19  ;;  %1823 = vpow2.f32 %v1133_v33  ;;  %v1141_v40 = vmul.f32 1.442695, %v1096_v27  ;;  %v1094_v18 = vmul.f32 -4.0, %v1070_v54 }
 0x1d0   : > { %v1524_v31 = vsel %vm1510_vm12, %v1401_v22, %v1395_v23  ;;  %v1416_v47 = vrot.slane %v1415_v42, 2  ;;  %1825 = vpow2.f32 %v1131_v2  ;;  %v1095_v49 = vmul.f32 -4.0, %v1071_v38 }
 0x1d1   : > { %v1525_v51 = vsel %vm1512_vm11, %v1407_v0, %v1524_v31  ;;  %v1300_v43 = vpop.permute.xlu2 %1299  ;;  %v1049_v20 = vsub.f32 %v2502_v24, %v2482_v13  ;;  %v1425_v17 = vadd.f32 %v1424_v41, %v1423_v14  ;;  %v1450_v26 = vrot.slane %v1333_v60, 4 }
 0x1d2   : > { %v1526_v62 = vsel %vm1514_vm14, %v1413_v36, %v1525_v51  ;;  %v1417_v9 = vadd.f32 %v1416_v47, %v1415_v42  ;;  %v1065_v19 = vmul.f32 %v1041_v58, %v1041_v58  ;;  %1827 = vpow2.f32 %v1141_v40 }
 0x1d3   : > { %v1137_v25 = vmul.f32 1.442695, %v1094_v18  ;;  %1829 = vpow2.f32 %v1129_v59  ;;  %v1139_v50 = vmul.f32 1.442695, %v1095_v49  ;;  %v1073_v44 = vmul.f32 %v1049_v20, %v1049_v20 }
 0x1d4   : > { %v1418_v11 = vrot.slane %v1417_v9, 1  ;;  %v1451_v30 = vadd.f32 %v1450_v26, %v1333_v60  ;;  %v1050_v24 = vsub.f32 %v2517_v34, %v2482_v13  ;;  %v1089_v23 = vmul.f32 -4.0, %v1065_v19 }
 0x1d5   : > { %v1824_v61 = vpop.eup %1823  ;;  %1831 = vpow2.f32 %v1137_v25  ;;  %v1097_v0 = vmul.f32 -4.0, %v1073_v44 }
 0x1d6   : > { %v1419_v39 = vadd.f32 %v1418_v11, %v1417_v9  ;;  %v1826_v55 = vpop.eup %1825  ;;  %1833 = vpow2.f32 %v1139_v50  ;;  %v1452_v21 = vrot.slane %v1451_v30, 2  ;;  %v1074_v16 = vmul.f32 %v1050_v24, %v1050_v24 }
 0x1d7   : > { %v1127_v53 = vmul.f32 1.442695, %v1089_v23  ;;  %v1143_v13 = vmul.f32 1.442695, %v1097_v0 }
 0x1d8   : > { %v1527_v57 = vsel %vm1516_vm15, %v1419_v39, %v1526_v62  ;;  %v1828_v31 = vpop.eup %1827  ;;  %v1453_v34 = vadd.f32 %v1452_v21, %v1451_v30  ;;  %v1098_v4 = vmul.f32 -4.0, %v1074_v16 }
 0x1d9   : > { %v2563_v10 = vsel %vm1518_vm0, %v1425_v17, %v1527_v57  ;;  %v1258_v37 = vpop.permute.xlu2 %1257  ;;  %v1830_v8 = vpop.eup %1829  ;;  %v1336_v51 = vmul.f32 %v1828_v31, %v1300_v43  ;;  %1835 = vpow2.f32 %v1127_v53 }
 0x1da   : > { %v1330_v29 = vmul.f32 %v1830_v8, %v1258_v37  ;;  %1837 = vpow2.f32 %v1143_v13  ;;  %v1454_v56 = vrot.slane %v1453_v34, 1  ;;  %v1145_v54 = vmul.f32 1.442695, %v1098_v4  ;;  %v1340_v4 = vld [vmem:[#allocation2] sm:$0xff] }
 0x1db   : > { %v1832_v32 = vpop.eup %1831  ;;  %v1468_v46 = vrot.slane %v1336_v51, 4 }
 0x1dc   : > { %v1834_v63 = vpop.eup %1833  ;;  %v1432_v52 = vrot.slane %v1330_v29, 4  ;;  %v1455_v58 = vadd.f32 %v1454_v56, %v1453_v34  ;;  %1839 = vpow2.f32 %v1145_v54 }
 0x1dd   : > { %v1469_v9 = vadd.f32 %v1468_v46, %v1336_v51 }
 0x1de   : > { %v1433_v41 = vadd.f32 %v1432_v52, %v1330_v29 }
 0x1df   : > { %v1836_v40 = vpop.eup %1835  ;;  %v1470_v17 = vrot.slane %v1469_v9, 2 }
 0x1e0   : > { %v1838_v20 = vpop.eup %1837 }
 0x1e1   : > { %v1265_v12 = vpop.permute.xlu1 %1264 }
 0x1e2   : > { %v1331_v1 = vmul.f32 %v1826_v55, %v1265_v12  ;;  %v1272_v7 = vpop.permute.xlu0 %1271  ;;  %v1840_v31 = vpop.eup %1839 }
 0x1e3   : > { %v1332_v22 = vmul.f32 %v1824_v61, %v1272_v7  ;;  %v1434_v61 = vrot.slane %v1433_v41, 2 }
 0x1e4   : > { %v1438_v36 = vrot.slane %v1331_v1, 4 }
 0x1e5   : > { %v1444_v28 = vrot.slane %v1332_v22, 4 }
 0x1e6   : > { %v1439_v5 = vadd.f32 %v1438_v36, %v1331_v1  ;;  %v1471_v1 = vadd.f32 %v1470_v17, %v1469_v9 }
 0x1e7   : > { %v1445_v62 = vadd.f32 %v1444_v28, %v1332_v22  ;;  %v1435_v22 = vadd.f32 %v1434_v61, %v1433_v41 }
 0x1e8   : > { %v1440_v45 = vrot.slane %v1439_v5, 2  ;;  %v1472_v51 = vrot.slane %v1471_v1, 1 }
 0x1e9   : > { %v1286_v15 = vpop.permute.xlu1 %1285  ;;  %v1446_v48 = vrot.slane %v1445_v62, 2  ;;  %v1436_v29 = vrot.slane %v1435_v22, 1 }
 0x1ea   : > { %v1441_v6 = vadd.f32 %v1440_v45, %v1439_v5  ;;  %v1334_v35 = vmul.f32 %v1832_v32, %v1286_v15  ;;  %v1293_v42 = vpop.permute.xlu0 %1292  ;;  %v1473_v32 = vadd.f32 %v1472_v51, %v1471_v1 }
 0x1eb   : > { %v1447_v14 = vadd.f32 %v1446_v48, %v1445_v62  ;;  %v1335_v47 = vmul.f32 %v1834_v63, %v1293_v42  ;;  %v1437_v63 = vadd.f32 %v1436_v29, %v1435_v22 }
 0x1ec   : > { %v1442_v33 = vrot.slane %v1441_v6, 1  ;;  %v1456_v3 = vrot.slane %v1334_v35, 4 }
 0x1ed   : > { %v1448_v27 = vrot.slane %v1447_v14, 1  ;;  %v1462_v2 = vrot.slane %v1335_v47, 4 }
 0x1ee   : > { %v1457_v38 = vadd.f32 %v1456_v3, %v1334_v35  ;;  %v1443_v60 = vadd.f32 %v1442_v33, %v1441_v6 }
 0x1ef   : > { %v1449_v11 = vadd.f32 %v1448_v27, %v1447_v14  ;;  %v1463_v59 = vadd.f32 %v1462_v2, %v1335_v47  ;;  %v1341_v27 = vld [vmem:[#allocation2 + $0x8] sm:$0xff] }
 0x1f0   : > { %v1458_v43 = vrot.slane %v1457_v38, 2 }
 0x1f1   : > { %v1531_v18 = vsel %vm1510_vm12, %v1449_v11, %v1443_v60  ;;  %v1251_v39 = vpop.permute.xlu1 %1250  ;;  %v1464_v49 = vrot.slane %v1463_v59, 2 }
 0x1f2   : > { %v1459_v26 = vadd.f32 %v1458_v43, %v1457_v38  ;;  %v1532_v57 = vsel %vm1512_vm11, %v1455_v58, %v1531_v18  ;;  %v1329_v19 = vmul.f32 %v1836_v40, %v1251_v39  ;;  %v1307_v25 = vpop.permute.xlu0 %1306 }
 0x1f3   : > { %v1465_v50 = vadd.f32 %v1464_v49, %v1463_v59  ;;  %v1337_v44 = vmul.f32 %v1838_v20, %v1307_v25 }
 0x1f4   : > { %v1460_v30 = vrot.slane %v1459_v26, 1  ;;  %v1426_v55 = vrot.slane %v1329_v19, 4 }
 0x1f5   : > { %v1466_v12 = vrot.slane %v1465_v50, 1  ;;  %v1474_v24 = vrot.slane %v1337_v44, 4 }
 0x1f6   : > { %v1461_v7 = vadd.f32 %v1460_v30, %v1459_v26  ;;  %v1427_v23 = vadd.f32 %v1426_v55, %v1329_v19 }
 0x1f7   : > { %v1467_v0 = vadd.f32 %v1466_v12, %v1465_v50  ;;  %v1475_v21 = vadd.f32 %v1474_v24, %v1337_v44 }
 0x1f8   : > { %v1428_v37 = vrot.slane %v1427_v23, 2  ;;  %v1533_v36 = vsel %vm1514_vm14, %v1461_v7, %v1532_v57 }
 0x1f9   : > { %v1534_v28 = vsel %vm1516_vm15, %v1467_v0, %v1533_v36  ;;  %v1314_v8 = vpop.permute.xlu1 %1313  ;;  %v1476_v16 = vrot.slane %v1475_v21, 2 }
 0x1fa   : > { %v1429_v5 = vadd.f32 %v1428_v37, %v1427_v23  ;;  %v1338_v53 = vmul.f32 %v1840_v31, %v1314_v8  ;;  %v1535_v42 = vsel %vm1518_vm0, %v1473_v32, %v1534_v28 }
 0x1fb   : > { %v1477_v62 = vadd.f32 %v1476_v16, %v1475_v21 }
 0x1fc   : > { %v1430_v13 = vrot.slane %v1429_v5, 1  ;;  %v1480_v34 = vrot.slane %v1338_v53, 4 }
 0x1fd   : > { %v1478_v45 = vrot.slane %v1477_v62, 1 }
 0x1fe   : > { %v1431_v15 = vadd.f32 %v1430_v13, %v1429_v5  ;;  %v1481_v48 = vadd.f32 %v1480_v34, %v1338_v53 }
 0x1ff   : > { %v1479_v46 = vadd.f32 %v1478_v45, %v1477_v62 }
 0x200   : > { %v1529_v6 = vsel %vm1520_vm1, %v1431_v15, %v2563_v10  ;;  %v1482_v35 = vrot.slane %v1481_v48, 2 }
 0x201   : > { %v1530_v52 = vsel %vm1522_vm2, %v1437_v63, %v1529_v6  ;;  %v1536_v14 = vsel %vm1520_vm1, %v1479_v46, %v1535_v42 }
 0x202   : > { %v1542_v47 = vadd.f32 %v1530_v52, %v1340_v4  ;;  %v1483_v56 = vadd.f32 %v1482_v35, %v1481_v48 }
 0x204   : > { %1545 = vst [vmem:[#allocation2] sm:$0xff] %v1542_v47  ;;  %v1484_v33 = vrot.slane %v1483_v56, 1 }
 0x206   : > { %v1485_v3 = vadd.f32 %v1484_v33, %v1483_v56 }
 0x207   : > { %1550 = sbr.rel (%p1688_p1) target bundleno = 532 (0x214), region = 40 }
 0x208   : > { %v1537_v2 = vsel %vm1522_vm2, %v1485_v3, %v1536_v14 }
 0x209   : > { %v1543_v54 = vadd.f32 %v1537_v2, %v1341_v27 }
 0x20b   : > { %1546 = vst [vmem:[#allocation2 + $0x8] sm:$0xff] %v1543_v54 }
 0x20c   : > { %v1551_v10 = vld [vmem:[#allocation2 + $0x10] sm:$0xff]  ;;  %v1552_v9 = vld [vmem:[#allocation2] sm:$0xff] }
 0x20d   : > { %1554 = vst [vmem:[%s2051_s23] sm:$0xff] %v1551_v10 }
 0x20e   : > { %1555 = vst [vmem:[%s2051_s23 + $0x8] sm:$0xff] %v1552_v9 }
 0x212   : > { %v1553_v38 = vld [vmem:[#allocation2 + $0x8] sm:$0xff] }
 0x213   : > { %1556 = vst [vmem:[%s2051_s23 + $0x10] sm:$0xff] %v1553_v38 }
 0x214 PF: > { %s1697_s6 = smul.u32 24, %s1923_s16  ;;  %s1570_s7 = sshll.u32 %s2051_s23, 4  ;;  %s1571_s7 = int_to_ptr.vmem [resolvable:$true] %s1570_s7 }
 0x215   : > { %s1558_s11 = scalar_lea.sflag [#allocation4], %s196_s29  ;;  %s1861_s16 = scalar_lea.hbm %s2629_s3, 48 }
 0x216   : > { %s1569_s15 = scalar_lea.hbm %s2629_s3, %s1697_s6 }
 0x217   : > { %s1572_s10 = sshll.u32 %s1569_s15, 4  ;;  %s1573_s10 = int_to_ptr.hbm [resolvable:$true] %s1572_s10 }
 0x218   : > { %s1855_s20 = sshra.s32 %s1573_s10, 4  ;;  %s1856_s20 = int_to_ptr.hbm [resolvable:$true] %s1855_s20 }
 0x219   : > { %s1857_s21 = scalar_lea.hbm %s1856_s20, 24  ;;  %p1862_p6 = scmp.lt.s32.totalorder %s1856_s20, %s2629_s3 }
 0x21a   : > { %p1858_p2 = scmp.ne.s32.totalorder %s1856_s20, %s1857_s21  ;;  %p1863_p7 = scmp.lt.s32.totalorder %s1861_s16, %s1857_s21 }
 0x21c   : > { %p1859_p4 = pnand %p1858_p2, %p2018_p3  ;;  %p1864_p8 = por %p1863_p7, %p1862_p6 }
 0x21e   : > { %p1860_p5 = pneg %p1859_p4 }
 0x220   : > { %p1865_p10 = pnand %p1864_p8, %p1860_p5 }
 0x222   : > { %1868 = shalt.err (!%p1865_p10)
}
 0x223   : > { %s1947_s29 = smov 128   ;;  %s1948_s4 = smov 8  }
 0x224   : > { %1698 = dma.vmem_to_hbm [thread:$0]  (%p2018_p3), %s1571_s7, 384, %s1573_s10, %s1558_s11, %s1947_s29, %s1947_s29, %s1948_s4  }
 0x225 PF: > { %p1704_p11 = scmp.ge.s32.totalorder %s1935_s19, 2  ;;  %s1587_s5 = sand.u32 1, %s1907_s12  }
 0x226   : > { %s1588_s6 = scalar_lea.sflag [#allocation4], %s1587_s5 }
 0x227   : > { %p1701_p12 = pnand %p1704_p11, %p2028_p9 }
 0x229   : > { %p1702_p13 = pneg %p1701_p12 }
 0x22b   : > { %1902 = dma.done.wait (%p1702_p13), %s1588_s6, 384  }
 0x22c   : > { %1904 = vsyncadd (%p1702_p13), %s1588_s6, 4294966912  ;;  %s16_s19 = sadd.s32 1, %s1935_s19   ;;  %s2644_s24 = sld [smem:[#allocation6_spill]] }
 0x22d   : > { %p13_p0 = scmp.ge.s32.totalorder %s16_s19, 8   ;;  %s2645_s12 = smov %s1911_s13 }
 0x22e   : > { %s2646_s13 = smov %s1915_s14  ;;  %s2647_s14 = smov %s2036_s28 }
 0x22f   : > { %s2648_s15 = smov %s1927_s17  ;;  %s2649_s16 = smov %s1931_s18 }
 0x230   : > { %s2650_s17 = smov %s2653_s22  ;;  %15 = sbr.rel (!%p13_p0) target bundleno = 5 (0x5), region = 78 }
 0x232   : > { %s2651_s18 = smov %s2644_s24 }
 0x235   :  { %1594 = vsyncpa [#allocation4], 1 }
 0x236   :  { %1596 = vsyncpa [#allocation4 + $0x1], 1 }

</bundles_post_ra>
